<compile_context>
chip_gen: v7x
topology: tpu7x:2x2x1
jax: 0.10.0
libtpu: 0.0.40
codegen_flags: <defaults>
</compile_context>

<pallas_src>
import jax
import jax.numpy as jnp
from jax import lax
from jax.experimental import pallas as pl
from jax.experimental.pallas import tpu as pltpu


# ----------------------------- Pallas kernels -----------------------------

def _upconv_attention_kernel(x_ref, skip_ref, wt_ref, ub_ref, wg_ref, bg_ref,
                             wx_ref, bx_ref, wp_ref, bp_ref, cat_ref):
    """Fused: 4-phase ConvTranspose2d + attention gate + channel concat.

    One grid step handles one batch element and one output-row parity `a`;
    both output-column parities are produced and packed along the channel
    (lane) axis so the HBM layout is plain NHWC after a free reshape.
    """
    H, W, inC = x_ref.shape
    two_mid = skip_ref.shape[-1]
    midC = two_mid // 2
    M = H * W

    def mm(a, b):  # bf16 MXU matmul, fp32 accumulation (no Precision.HIGHEST)
        return jnp.dot(a.astype(jnp.bfloat16), b.astype(jnp.bfloat16),
                       preferred_element_type=jnp.float32)

    # Shifted copies of the input tile (zero fill past the bottom/right edge).
    x = x_ref[...]                                            # (H, W, inC) bf16
    zrow = jnp.zeros((1, W, inC), x.dtype)
    zcol = jnp.zeros((H, 1, inC), x.dtype)
    x_dy = jnp.concatenate([x[1:, :, :], zrow], axis=0)       # x[m+1, n  ]
    x_dx = jnp.concatenate([x[:, 1:, :], zcol], axis=1)       # x[m,   n+1]
    x_dxy = jnp.concatenate([x_dy[:, 1:, :], zcol], axis=1)   # x[m+1, n+1]
    taps = [t.reshape(M, inC) for t in (x, x_dx, x_dy, x_dxy)]

    skipv = skip_ref[...].reshape(M, two_mid)                 # fp32
    bias_up = ub_ref[...]                                     # (1, trpC) fp32

    pieces = []
    for b in range(2):                                        # column parity
        # up-scale phase (a, b): sum of (at most) 4 taps
        up = bias_up + mm(taps[0], wt_ref[4 * b + 0])
        for j in range(1, 4):
            up = up + mm(taps[j], wt_ref[4 * b + j])
        # attention gate (1x1 convs with BN folded), fp32 elementwise
        skip_b = skipv[:, b * midC:(b + 1) * midC]
        g1 = mm(up, wg_ref[...]) + bg_ref[...]
        x1 = mm(skip_b, wx_ref[...]) + bx_ref[...]
        pre = jnp.maximum(g1 + x1, 0.0)
        psi = jnp.sum(pre * wp_ref[...], axis=-1, keepdims=True) + bp_ref[...]
        psi = jax.nn.sigmoid(psi)
        pieces += [skip_b * psi, up]                          # [out_mid_b, up_b]

    packed = jnp.concatenate(pieces, axis=-1)                 # (M, 2*(midC+trpC))
    cat_ref[...] = packed.reshape(H, 1, W, packed.shape[-1]).astype(cat_ref.dtype)


def _conv3x3_bn_relu_kernel(cat_ref, w_ref, b_ref, o_ref):
    """Fused 3x3 conv (9 in-VMEM taps) + folded BN + ReLU, channels-first out."""
    Ho, Wo, Cc = cat_ref.shape
    outC = w_ref.shape[1]
    Mo = Ho * Wo

    cat = cat_ref[...]                                        # (Ho, Wo, Cc) bf16
    zr = jnp.zeros((1, Wo, Cc), cat.dtype)
    catp = jnp.concatenate([zr, cat, zr], axis=0)             # pad H
    zc = jnp.zeros((Ho + 2, 1, Cc), cat.dtype)
    catp = jnp.concatenate([zc, catp, zc], axis=1)            # pad W

    acc = jnp.zeros((outC, Mo), jnp.float32)
    for ky in range(3):
        for kx in range(3):
            tap = catp[ky:ky + Ho, kx:kx + Wo, :].reshape(Mo, Cc)
            # (outC, Cc) . (Mo, Cc)^T  -> (outC, Mo): spatial axis on lanes.
            acc = acc + lax.dot_general(
                w_ref[3 * ky + kx], tap,
                dimension_numbers=(((1,), (1,)), ((), ())),
                preferred_element_type=jnp.float32)
    o_ref[...] = jnp.maximum(acc + b_ref[...], 0.0)


# ------------------------------- JAX glue ---------------------------------

def _bn_scale_shift(gamma, beta, mean, var, eps=1e-5):
    s = gamma / jnp.sqrt(var + eps)
    return s, beta - mean * s


def decoder_block_forward(x_nchw, skip_nchw, p):
    N, inC, H, W = x_nchw.shape
    Ho, Wo = 2 * H, 2 * W
    trpC = p['up_w'].shape[1]
    midC = skip_nchw.shape[1]
    Fi = p['att_wg'].shape[0]
    outC = p['dc_w'].shape[0]
    Cc = midC + trpC

    # Channels-last activations (channels sit on the 128-lane axis in-kernel).
    x = jnp.transpose(x_nchw, (0, 2, 3, 1)).astype(jnp.bfloat16)        # (N,H,W,inC)
    skip = jnp.transpose(skip_nchw, (0, 2, 3, 1)).astype(jnp.float32)   # (N,Ho,Wo,midC)
    # Pack the output-column parity into the channel axis (free reshape).
    skip_pk = skip.reshape(N, H, 2, W, 2 * midC)

    # --- 4-phase (sub-pixel) ConvTranspose2d taps ---
    # up[2m+a, 2n+b] = bias + sum_{dy,dx in {0,1}} x[m+dy, n+dx] . W[:,:,ky,kx]
    # with ky = a+1-2dy, kx = b+1-2dx (tap dropped when out of kernel range).
    up_w = p['up_w'].astype(jnp.float32)                      # (inC, trpC, 3, 3)
    zero_tap = jnp.zeros((inC, trpC), jnp.float32)
    wt_rows = []
    for a in range(2):
        row = []
        for b in range(2):
            for dy in range(2):
                for dx in range(2):
                    ky, kx = a + 1 - 2 * dy, b + 1 - 2 * dx
                    row.append(up_w[:, :, ky, kx] if (ky >= 0 and kx >= 0)
                               else zero_tap)
        wt_rows.append(jnp.stack(row, axis=0))                # (8, inC, trpC)
    wt_phase = jnp.stack(wt_rows, axis=0).astype(jnp.bfloat16)  # (2, 8, inC, trpC)
    up_b = p['up_b'].reshape(1, trpC).astype(jnp.float32)

    # --- attention gate: fold BatchNorm (running stats) into 1x1 convs ---
    sg, tg = _bn_scale_shift(*p['att_bng'])
    sx, tx = _bn_scale_shift(*p['att_bnx'])
    sp, tp = _bn_scale_shift(*p['att_bnp'])
    wg = (p['att_wg'][:, :, 0, 0].T * sg[None, :]).astype(jnp.bfloat16)   # (trpC,Fi)
    bg = (p['att_bg'] * sg + tg).reshape(1, Fi)
    wx = (p['att_wx'][:, :, 0, 0].T * sx[None, :]).astype(jnp.bfloat16)   # (midC,Fi)
    bx = (p['att_bx'] * sx + tx).reshape(1, Fi)
    wp = (p['att_wp'][:, :, 0, 0] * sp[0]).reshape(1, Fi)                 # fp32
    bp = (p['att_bp'] * sp + tp).reshape(1, 1)

    # --- kernel A: up-scale + attention + concat (writes `cat` once, bf16) ---
    cat_pk = pl.pallas_call(
        _upconv_attention_kernel,
        out_shape=jax.ShapeDtypeStruct((N, H, 2, W, 2 * Cc), jnp.bfloat16),
        grid=(N, 2),
        in_specs=[
            pl.BlockSpec((None, H, W, inC), lambda n, a: (n, 0, 0, 0)),
            pl.BlockSpec((None, H, 1, W, 2 * midC),
                         lambda n, a: (n, 0, a, 0, 0)),
            pl.BlockSpec((None, 8, inC, trpC), lambda n, a: (a, 0, 0, 0)),
            pl.BlockSpec((1, trpC), lambda n, a: (0, 0)),
            pl.BlockSpec((trpC, Fi), lambda n, a: (0, 0)),
            pl.BlockSpec((1, Fi), lambda n, a: (0, 0)),
            pl.BlockSpec((midC, Fi), lambda n, a: (0, 0)),
            pl.BlockSpec((1, Fi), lambda n, a: (0, 0)),
            pl.BlockSpec((1, Fi), lambda n, a: (0, 0)),
            pl.BlockSpec((1, 1), lambda n, a: (0, 0)),
        ],
        out_specs=pl.BlockSpec((None, H, 1, W, 2 * Cc),
                               lambda n, a: (n, 0, a, 0, 0)),
        compiler_params=pltpu.CompilerParams(
            dimension_semantics=("parallel", "parallel")),
    )(x, skip_pk, wt_phase, up_b, wg, bg, wx, bx, wp, bp)
    cat = cat_pk.reshape(N, Ho, Wo, Cc)        # free reshape -> NHWC `cat`

    # --- kernel B: 3x3 conv + BN + ReLU, lane-dense channels-first output ---
    sd, td = _bn_scale_shift(*p['dc_bn'])
    w_dc = p['dc_w'].astype(jnp.float32) * sd[:, None, None, None]
    w_dc9 = jnp.stack([w_dc[:, :, ky, kx]
                       for ky in range(3) for kx in range(3)],
                      axis=0).astype(jnp.bfloat16)            # (9, outC, Cc)
    b_dc = (p['dc_b'] * sd + td).reshape(outC, 1)

    out_cm = pl.pallas_call(
        _conv3x3_bn_relu_kernel,
        out_shape=jax.ShapeDtypeStruct((N, outC, Ho * Wo), jnp.float32),
        grid=(N,),
        in_specs=[
            pl.BlockSpec((None, Ho, Wo, Cc), lambda n: (n, 0, 0, 0)),
            pl.BlockSpec((9, outC, Cc), lambda n: (0, 0, 0)),
            pl.BlockSpec((outC, 1), lambda n: (0, 0)),
        ],
        out_specs=pl.BlockSpec((None, outC, Ho * Wo), lambda n: (n, 0, 0)),
        compiler_params=pltpu.CompilerParams(
            dimension_semantics=("parallel",)),
    )(cat, w_dc9, b_dc)

    return out_cm.reshape(N, outC, Ho, Wo)     # already NCHW: no transpose


# ----------------------- pure-JAX reference (check) ------------------------

def decoder_block_reference(x, skip, p):
    dn = ('NCHW', 'OIHW', 'NCHW')
    hp = lax.Precision.HIGHEST

    def conv(y, w, padding):
        return lax.conv_general_dilated(y, w, (1, 1), padding,
                                        dimension_numbers=dn, precision=hp)

    def bn(y, bnp):
        gamma, beta, mean, var = bnp
        s = gamma / jnp.sqrt(var + 1e-5)
        return (y - mean[None, :, None, None]) * s[None, :, None, None] \
            + beta[None, :, None, None]

    def add_b(y, b):
        return y + b[None, :, None, None]

    w_up = jnp.flip(p['up_w'], (2, 3)).transpose(1, 0, 2, 3)
    up = lax.conv_general_dilated(x, w_up, (1, 1), ((1, 2), (1, 2)),
                                  lhs_dilation=(2, 2), dimension_numbers=dn,
                                  precision=hp)
    up = add_b(up, p['up_b'])
    g1 = bn(add_b(conv(up, p['att_wg'], 'VALID'), p['att_bg']), p['att_bng'])
    x1 = bn(add_b(conv(skip, p['att_wx'], 'VALID'), p['att_bx']), p['att_bnx'])
    psi = jnp.maximum(g1 + x1, 0.0)
    psi = jax.nn.sigmoid(bn(add_b(conv(psi, p['att_wp'], 'VALID'), p['att_bp']),
                            p['att_bnp']))
    out_mid = skip * psi
    cat = jnp.concatenate([out_mid, up], axis=1)
    y = bn(add_b(conv(cat, p['dc_w'], ((1, 1), (1, 1))), p['dc_b']), p['dc_bn'])
    return jnp.maximum(y, 0.0)


# ------------------------------ params init -------------------------------

def init_params(key, inC, trpC, midC, outC):
    ks = iter(jax.random.split(key, 32))

    def rn(shape, scale=0.1):
        return scale * jax.random.normal(next(ks), shape, jnp.float32)

    def bn_params(c):
        gamma = 1.0 + rn((c,))
        beta = rn((c,))
        mean = rn((c,))
        var = 1.0 + jnp.abs(rn((c,)))
        return (gamma, beta, mean, var)

    return {
        # ConvTranspose2d weight layout: (inC, trpC, kH, kW)
        'up_w': rn((inC, trpC, 3, 3), 0.2), 'up_b': rn((trpC,)),
        # Attention_block
        'att_wg': rn((outC, trpC, 1, 1), 0.2), 'att_bg': rn((outC,)), 'att_bng': bn_params(outC),
        'att_wx': rn((outC, midC, 1, 1), 0.2), 'att_bx': rn((outC,)), 'att_bnx': bn_params(outC),
        'att_wp': rn((1, outC, 1, 1), 0.2), 'att_bp': rn((1,)), 'att_bnp': bn_params(1),
        # double_conv (SingleReLUBNConv): Conv2d(trpC*2 -> outC, 3x3, pad 1) + BN
        'dc_w': rn((outC, trpC * 2, 3, 3), 0.2), 'dc_b': rn((outC,)), 'dc_bn': bn_params(outC),
    }


# --------------------------------- main ------------------------------------

if __name__ == "__main__":
    N, inC, H, W = 2, 8, 8, 8
    trpC = midC = 8          # midC must equal trpC: cat channels == trpC*2
    outC = 8

    key = jax.random.PRNGKey(0)
    kx_, ks_, kp_ = jax.random.split(key, 3)
    x = jax.random.normal(kx_, (N, inC, H, W), jnp.float32)
    skip = jax.random.normal(ks_, (N, midC, 2 * H, 2 * W), jnp.float32)
    params = init_params(kp_, inC, trpC, midC, outC)

    out = jax.jit(decoder_block_forward)(x, skip, params)
    out = jax.block_until_ready(out)
    assert out.shape == (N, outC, 2 * H, 2 * W), out.shape

    ref = decoder_block_reference(x, skip, params)
    err = float(jnp.max(jnp.abs(out - ref)))
    # bf16 MXU matmuls (fp32 accumulation): tolerance loosened vs. fp32-HIGHEST.
    assert err < 2.5e-1, f"max abs err = {err}"

    print("KERNEL_OK")
</pallas_src>

<mosaic_0001>
module attributes {stable_mosaic.version = 11 : i64} {
  func.func @_upconv_attention_kernel(%arg0: i32, %arg1: i32, %arg2: memref<1x8x8x8xbf16, #tpu.memory_space<vmem>>, %arg3: memref<1x8x1x8x16xf32, #tpu.memory_space<vmem>>, %arg4: memref<1x8x8x8xbf16, #tpu.memory_space<vmem>>, %arg5: memref<1x8xf32, #tpu.memory_space<vmem>>, %arg6: memref<8x8xbf16, #tpu.memory_space<vmem>>, %arg7: memref<1x8xf32, #tpu.memory_space<vmem>>, %arg8: memref<8x8xbf16, #tpu.memory_space<vmem>>, %arg9: memref<1x8xf32, #tpu.memory_space<vmem>>, %arg10: memref<1x8xf32, #tpu.memory_space<vmem>>, %arg11: memref<1x1xf32, #tpu.memory_space<vmem>>, %arg12: memref<1x8x1x8x32xbf16, #tpu.memory_space<vmem>>) attributes {dimension_semantics = [#tpu.dimension_semantics<parallel>, #tpu.dimension_semantics<parallel>], iteration_bounds = array<i64: 2, 2>, scalar_prefetch = 0 : i64, scratch_operands = 0 : i64, tpu.core_type = #tpu.core_type<tc>, window_params = [{transform_indices = @transform_0, window_bounds = array<i64: 1, 8, 8, 8>}, {transform_indices = @transform_1, window_bounds = array<i64: 1, 8, 1, 8, 16>}, {transform_indices = @transform_2, window_bounds = array<i64: 1, 8, 8, 8>}, {pipeline_mode = #tpu.pipeline_mode<synchronous>, transform_indices = @transform_3, window_bounds = array<i64: 1, 8>}, {pipeline_mode = #tpu.pipeline_mode<synchronous>, transform_indices = @transform_4, window_bounds = array<i64: 8, 8>}, {pipeline_mode = #tpu.pipeline_mode<synchronous>, transform_indices = @transform_5, window_bounds = array<i64: 1, 8>}, {pipeline_mode = #tpu.pipeline_mode<synchronous>, transform_indices = @transform_6, window_bounds = array<i64: 8, 8>}, {pipeline_mode = #tpu.pipeline_mode<synchronous>, transform_indices = @transform_7, window_bounds = array<i64: 1, 8>}, {pipeline_mode = #tpu.pipeline_mode<synchronous>, transform_indices = @transform_8, window_bounds = array<i64: 1, 8>}, {pipeline_mode = #tpu.pipeline_mode<synchronous>, transform_indices = @transform_9, window_bounds = array<i64: 1, 1>}, {transform_indices = @transform_10, window_bounds = array<i64: 1, 8, 1, 8, 32>}]} {
    %c0 = arith.constant 0 : index
    %c0_0 = arith.constant 0 : index
    %c0_1 = arith.constant 0 : index
    %c0_2 = arith.constant 0 : index
    %0 = vector.load %arg2[%c0, %c0_0, %c0_1, %c0_2] : memref<1x8x8x8xbf16, #tpu.memory_space<vmem>>, vector<1x8x8x8xbf16>
    %1 = vector.shape_cast %0 : vector<1x8x8x8xbf16> to vector<8x8x8xbf16>
    %cst = arith.constant 0.000000e+00 : bf16
    %2 = vector.broadcast %cst : bf16 to vector<1x8x8xbf16>
    %cst_3 = arith.constant 0.000000e+00 : bf16
    %3 = vector.broadcast %cst_3 : bf16 to vector<8x1x8xbf16>
    %4 = vector.extract_strided_slice %1 {offsets = [1, 0, 0], sizes = [7, 8, 8], strides = [1, 1, 1]} : vector<8x8x8xbf16> to vector<7x8x8xbf16>
    %5 = tpu.concatenate %4, %2 in 0 : vector<7x8x8xbf16>, vector<1x8x8xbf16> -> vector<8x8x8xbf16>
    %6 = vector.extract_strided_slice %1 {offsets = [0, 1, 0], sizes = [8, 7, 8], strides = [1, 1, 1]} : vector<8x8x8xbf16> to vector<8x7x8xbf16>
    %7 = tpu.concatenate %6, %3 in 1 : vector<8x7x8xbf16>, vector<8x1x8xbf16> -> vector<8x8x8xbf16>
    %8 = vector.extract_strided_slice %5 {offsets = [0, 1, 0], sizes = [8, 7, 8], strides = [1, 1, 1]} : vector<8x8x8xbf16> to vector<8x7x8xbf16>
    %9 = tpu.concatenate %8, %3 in 1 : vector<8x7x8xbf16>, vector<8x1x8xbf16> -> vector<8x8x8xbf16>
    %10 = vector.shape_cast %1 : vector<8x8x8xbf16> to vector<64x8xbf16>
    %11 = vector.shape_cast %7 : vector<8x8x8xbf16> to vector<64x8xbf16>
    %12 = vector.shape_cast %5 : vector<8x8x8xbf16> to vector<64x8xbf16>
    %13 = vector.shape_cast %9 : vector<8x8x8xbf16> to vector<64x8xbf16>
    %c0_4 = arith.constant 0 : index
    %c0_5 = arith.constant 0 : index
    %c0_6 = arith.constant 0 : index
    %c0_7 = arith.constant 0 : index
    %c0_8 = arith.constant 0 : index
    %14 = vector.load %arg3[%c0_4, %c0_5, %c0_6, %c0_7, %c0_8] : memref<1x8x1x8x16xf32, #tpu.memory_space<vmem>>, vector<1x8x1x8x16xf32>
    %15 = vector.shape_cast %14 : vector<1x8x1x8x16xf32> to vector<8x1x8x16xf32>
    %16 = vector.shape_cast %15 : vector<8x1x8x16xf32> to vector<64x16xf32>
    %c0_9 = arith.constant 0 : index
    %c0_10 = arith.constant 0 : index
    %17 = vector.load %arg5[%c0_9, %c0_10] : memref<1x8xf32, #tpu.memory_space<vmem>>, vector<1x8xf32>
    %c0_11 = arith.constant 0 : index
    %c0_12 = arith.constant 0 : index
    %c0_13 = arith.constant 0 : index
    %c0_14 = arith.constant 0 : index
    %18 = vector.load %arg4[%c0_11, %c0_12, %c0_13, %c0_14] : memref<1x8x8x8xbf16, #tpu.memory_space<vmem>>, vector<1x1x8x8xbf16>
    %19 = vector.shape_cast %18 : vector<1x1x8x8xbf16> to vector<8x8xbf16>
    %cst_15 = arith.constant dense<0.000000e+00> : vector<64x8xf32>
    %20 = tpu.matmul %10, %19, %cst_15 {dimension_numbers = #tpu.dot_dimension_numbers<[1], [0], [0], [1], [0, 0, 1, 1], [], []>} : vector<64x8xbf16>, vector<8x8xbf16>, vector<64x8xf32> -> vector<64x8xf32>
    %21 = vector.broadcast %17 : vector<1x8xf32> to vector<64x8xf32>
    %22 = arith.addf %21, %20 : vector<64x8xf32>
    %c0_16 = arith.constant 0 : index
    %c1 = arith.constant 1 : index
    %c0_17 = arith.constant 0 : index
    %c0_18 = arith.constant 0 : index
    %23 = vector.load %arg4[%c0_16, %c1, %c0_17, %c0_18] : memref<1x8x8x8xbf16, #tpu.memory_space<vmem>>, vector<1x1x8x8xbf16>
    %24 = vector.shape_cast %23 : vector<1x1x8x8xbf16> to vector<8x8xbf16>
    %cst_19 = arith.constant dense<0.000000e+00> : vector<64x8xf32>
    %25 = tpu.matmul %11, %24, %cst_19 {dimension_numbers = #tpu.dot_dimension_numbers<[1], [0], [0], [1], [0, 0, 1, 1], [], []>} : vector<64x8xbf16>, vector<8x8xbf16>, vector<64x8xf32> -> vector<64x8xf32>
    %26 = arith.addf %22, %25 : vector<64x8xf32>
    %c0_20 = arith.constant 0 : index
    %c2 = arith.constant 2 : index
    %c0_21 = arith.constant 0 : index
    %c0_22 = arith.constant 0 : index
    %27 = vector.load %arg4[%c0_20, %c2, %c0_21, %c0_22] : memref<1x8x8x8xbf16, #tpu.memory_space<vmem>>, vector<1x1x8x8xbf16>
    %28 = vector.shape_cast %27 : vector<1x1x8x8xbf16> to vector<8x8xbf16>
    %cst_23 = arith.constant dense<0.000000e+00> : vector<64x8xf32>
    %29 = tpu.matmul %12, %28, %cst_23 {dimension_numbers = #tpu.dot_dimension_numbers<[1], [0], [0], [1], [0, 0, 1, 1], [], []>} : vector<64x8xbf16>, vector<8x8xbf16>, vector<64x8xf32> -> vector<64x8xf32>
    %30 = arith.addf %26, %29 : vector<64x8xf32>
    %c0_24 = arith.constant 0 : index
    %c3 = arith.constant 3 : index
    %c0_25 = arith.constant 0 : index
    %c0_26 = arith.constant 0 : index
    %31 = vector.load %arg4[%c0_24, %c3, %c0_25, %c0_26] : memref<1x8x8x8xbf16, #tpu.memory_space<vmem>>, vector<1x1x8x8xbf16>
    %32 = vector.shape_cast %31 : vector<1x1x8x8xbf16> to vector<8x8xbf16>
    %cst_27 = arith.constant dense<0.000000e+00> : vector<64x8xf32>
    %33 = tpu.matmul %13, %32, %cst_27 {dimension_numbers = #tpu.dot_dimension_numbers<[1], [0], [0], [1], [0, 0, 1, 1], [], []>} : vector<64x8xbf16>, vector<8x8xbf16>, vector<64x8xf32> -> vector<64x8xf32>
    %34 = arith.addf %30, %33 : vector<64x8xf32>
    %35 = vector.extract_strided_slice %16 {offsets = [0, 0], sizes = [64, 8], strides = [1, 1]} : vector<64x16xf32> to vector<64x8xf32>
    %c0_28 = arith.constant 0 : index
    %c0_29 = arith.constant 0 : index
    %36 = vector.load %arg6[%c0_28, %c0_29] : memref<8x8xbf16, #tpu.memory_space<vmem>>, vector<8x8xbf16>
    %37 = arith.truncf %34 : vector<64x8xf32> to vector<64x8xbf16>
    %cst_30 = arith.constant dense<0.000000e+00> : vector<64x8xf32>
    %38 = tpu.matmul %37, %36, %cst_30 {dimension_numbers = #tpu.dot_dimension_numbers<[1], [0], [0], [1], [0, 0, 1, 1], [], []>} : vector<64x8xbf16>, vector<8x8xbf16>, vector<64x8xf32> -> vector<64x8xf32>
    %c0_31 = arith.constant 0 : index
    %c0_32 = arith.constant 0 : index
    %39 = vector.load %arg7[%c0_31, %c0_32] : memref<1x8xf32, #tpu.memory_space<vmem>>, vector<1x8xf32>
    %40 = vector.broadcast %39 : vector<1x8xf32> to vector<64x8xf32>
    %41 = arith.addf %38, %40 : vector<64x8xf32>
    %c0_33 = arith.constant 0 : index
    %c0_34 = arith.constant 0 : index
    %42 = vector.load %arg8[%c0_33, %c0_34] : memref<8x8xbf16, #tpu.memory_space<vmem>>, vector<8x8xbf16>
    %43 = arith.truncf %35 : vector<64x8xf32> to vector<64x8xbf16>
    %cst_35 = arith.constant dense<0.000000e+00> : vector<64x8xf32>
    %44 = tpu.matmul %43, %42, %cst_35 {dimension_numbers = #tpu.dot_dimension_numbers<[1], [0], [0], [1], [0, 0, 1, 1], [], []>} : vector<64x8xbf16>, vector<8x8xbf16>, vector<64x8xf32> -> vector<64x8xf32>
    %c0_36 = arith.constant 0 : index
    %c0_37 = arith.constant 0 : index
    %45 = vector.load %arg9[%c0_36, %c0_37] : memref<1x8xf32, #tpu.memory_space<vmem>>, vector<1x8xf32>
    %46 = vector.broadcast %45 : vector<1x8xf32> to vector<64x8xf32>
    %47 = arith.addf %44, %46 : vector<64x8xf32>
    %48 = arith.addf %41, %47 : vector<64x8xf32>
    %cst_38 = arith.constant 0.000000e+00 : f32
    %49 = vector.broadcast %cst_38 : f32 to vector<64x8xf32>
    %50 = arith.maximumf %48, %49 : vector<64x8xf32>
    %c0_39 = arith.constant 0 : index
    %c0_40 = arith.constant 0 : index
    %51 = vector.load %arg10[%c0_39, %c0_40] : memref<1x8xf32, #tpu.memory_space<vmem>>, vector<1x8xf32>
    %52 = vector.broadcast %51 : vector<1x8xf32> to vector<64x8xf32>
    %53 = arith.mulf %50, %52 : vector<64x8xf32>
    %cst_41 = arith.constant dense<0.000000e+00> : vector<64xf32>
    %54 = vector.multi_reduction <add>, %53, %cst_41 [1] : vector<64x8xf32> to vector<64xf32>
    %55 = vector.shape_cast %54 : vector<64xf32> to vector<64x1xf32>
    %c0_42 = arith.constant 0 : index
    %c0_43 = arith.constant 0 : index
    %56 = vector.load %arg11[%c0_42, %c0_43] : memref<1x1xf32, #tpu.memory_space<vmem>>, vector<1x1xf32>
    %57 = vector.broadcast %56 : vector<1x1xf32> to vector<64x1xf32>
    %58 = arith.addf %55, %57 : vector<64x1xf32>
    %59 = arith.negf %58 : vector<64x1xf32>
    %60 = math.exp %59 : vector<64x1xf32>
    %cst_44 = arith.constant 1.000000e+00 : f32
    %61 = vector.broadcast %cst_44 : f32 to vector<64x1xf32>
    %62 = arith.addf %61, %60 : vector<64x1xf32>
    %63 = arith.divf %61, %62 : vector<64x1xf32>
    %64 = vector.broadcast %63 : vector<64x1xf32> to vector<64x8xf32>
    %65 = arith.mulf %35, %64 : vector<64x8xf32>
    %c0_45 = arith.constant 0 : index
    %c4 = arith.constant 4 : index
    %c0_46 = arith.constant 0 : index
    %c0_47 = arith.constant 0 : index
    %66 = vector.load %arg4[%c0_45, %c4, %c0_46, %c0_47] : memref<1x8x8x8xbf16, #tpu.memory_space<vmem>>, vector<1x1x8x8xbf16>
    %67 = vector.shape_cast %66 : vector<1x1x8x8xbf16> to vector<8x8xbf16>
    %cst_48 = arith.constant dense<0.000000e+00> : vector<64x8xf32>
    %68 = tpu.matmul %10, %67, %cst_48 {dimension_numbers = #tpu.dot_dimension_numbers<[1], [0], [0], [1], [0, 0, 1, 1], [], []>} : vector<64x8xbf16>, vector<8x8xbf16>, vector<64x8xf32> -> vector<64x8xf32>
    %69 = vector.broadcast %17 : vector<1x8xf32> to vector<64x8xf32>
    %70 = arith.addf %69, %68 : vector<64x8xf32>
    %c0_49 = arith.constant 0 : index
    %c5 = arith.constant 5 : index
    %c0_50 = arith.constant 0 : index
    %c0_51 = arith.constant 0 : index
    %71 = vector.load %arg4[%c0_49, %c5, %c0_50, %c0_51] : memref<1x8x8x8xbf16, #tpu.memory_space<vmem>>, vector<1x1x8x8xbf16>
    %72 = vector.shape_cast %71 : vector<1x1x8x8xbf16> to vector<8x8xbf16>
    %cst_52 = arith.constant dense<0.000000e+00> : vector<64x8xf32>
    %73 = tpu.matmul %11, %72, %cst_52 {dimension_numbers = #tpu.dot_dimension_numbers<[1], [0], [0], [1], [0, 0, 1, 1], [], []>} : vector<64x8xbf16>, vector<8x8xbf16>, vector<64x8xf32> -> vector<64x8xf32>
    %74 = arith.addf %70, %73 : vector<64x8xf32>
    %c0_53 = arith.constant 0 : index
    %c6 = arith.constant 6 : index
    %c0_54 = arith.constant 0 : index
    %c0_55 = arith.constant 0 : index
    %75 = vector.load %arg4[%c0_53, %c6, %c0_54, %c0_55] : memref<1x8x8x8xbf16, #tpu.memory_space<vmem>>, vector<1x1x8x8xbf16>
    %76 = vector.shape_cast %75 : vector<1x1x8x8xbf16> to vector<8x8xbf16>
    %cst_56 = arith.constant dense<0.000000e+00> : vector<64x8xf32>
    %77 = tpu.matmul %12, %76, %cst_56 {dimension_numbers = #tpu.dot_dimension_numbers<[1], [0], [0], [1], [0, 0, 1, 1], [], []>} : vector<64x8xbf16>, vector<8x8xbf16>, vector<64x8xf32> -> vector<64x8xf32>
    %78 = arith.addf %74, %77 : vector<64x8xf32>
    %c0_57 = arith.constant 0 : index
    %c7 = arith.constant 7 : index
    %c0_58 = arith.constant 0 : index
    %c0_59 = arith.constant 0 : index
    %79 = vector.load %arg4[%c0_57, %c7, %c0_58, %c0_59] : memref<1x8x8x8xbf16, #tpu.memory_space<vmem>>, vector<1x1x8x8xbf16>
    %80 = vector.shape_cast %79 : vector<1x1x8x8xbf16> to vector<8x8xbf16>
    %cst_60 = arith.constant dense<0.000000e+00> : vector<64x8xf32>
    %81 = tpu.matmul %13, %80, %cst_60 {dimension_numbers = #tpu.dot_dimension_numbers<[1], [0], [0], [1], [0, 0, 1, 1], [], []>} : vector<64x8xbf16>, vector<8x8xbf16>, vector<64x8xf32> -> vector<64x8xf32>
    %82 = arith.addf %78, %81 : vector<64x8xf32>
    %83 = vector.extract_strided_slice %16 {offsets = [0, 8], sizes = [64, 8], strides = [1, 1]} : vector<64x16xf32> to vector<64x8xf32>
    %c0_61 = arith.constant 0 : index
    %c0_62 = arith.constant 0 : index
    %84 = vector.load %arg6[%c0_61, %c0_62] : memref<8x8xbf16, #tpu.memory_space<vmem>>, vector<8x8xbf16>
    %85 = arith.truncf %82 : vector<64x8xf32> to vector<64x8xbf16>
    %cst_63 = arith.constant dense<0.000000e+00> : vector<64x8xf32>
    %86 = tpu.matmul %85, %84, %cst_63 {dimension_numbers = #tpu.dot_dimension_numbers<[1], [0], [0], [1], [0, 0, 1, 1], [], []>} : vector<64x8xbf16>, vector<8x8xbf16>, vector<64x8xf32> -> vector<64x8xf32>
    %c0_64 = arith.constant 0 : index
    %c0_65 = arith.constant 0 : index
    %87 = vector.load %arg7[%c0_64, %c0_65] : memref<1x8xf32, #tpu.memory_space<vmem>>, vector<1x8xf32>
    %88 = vector.broadcast %87 : vector<1x8xf32> to vector<64x8xf32>
    %89 = arith.addf %86, %88 : vector<64x8xf32>
    %c0_66 = arith.constant 0 : index
    %c0_67 = arith.constant 0 : index
    %90 = vector.load %arg8[%c0_66, %c0_67] : memref<8x8xbf16, #tpu.memory_space<vmem>>, vector<8x8xbf16>
    %91 = arith.truncf %83 : vector<64x8xf32> to vector<64x8xbf16>
    %cst_68 = arith.constant dense<0.000000e+00> : vector<64x8xf32>
    %92 = tpu.matmul %91, %90, %cst_68 {dimension_numbers = #tpu.dot_dimension_numbers<[1], [0], [0], [1], [0, 0, 1, 1], [], []>} : vector<64x8xbf16>, vector<8x8xbf16>, vector<64x8xf32> -> vector<64x8xf32>
    %c0_69 = arith.constant 0 : index
    %c0_70 = arith.constant 0 : index
    %93 = vector.load %arg9[%c0_69, %c0_70] : memref<1x8xf32, #tpu.memory_space<vmem>>, vector<1x8xf32>
    %94 = vector.broadcast %93 : vector<1x8xf32> to vector<64x8xf32>
    %95 = arith.addf %92, %94 : vector<64x8xf32>
    %96 = arith.addf %89, %95 : vector<64x8xf32>
    %cst_71 = arith.constant 0.000000e+00 : f32
    %97 = vector.broadcast %cst_71 : f32 to vector<64x8xf32>
    %98 = arith.maximumf %96, %97 : vector<64x8xf32>
    %c0_72 = arith.constant 0 : index
    %c0_73 = arith.constant 0 : index
    %99 = vector.load %arg10[%c0_72, %c0_73] : memref<1x8xf32, #tpu.memory_space<vmem>>, vector<1x8xf32>
    %100 = vector.broadcast %99 : vector<1x8xf32> to vector<64x8xf32>
    %101 = arith.mulf %98, %100 : vector<64x8xf32>
    %cst_74 = arith.constant dense<0.000000e+00> : vector<64xf32>
    %102 = vector.multi_reduction <add>, %101, %cst_74 [1] : vector<64x8xf32> to vector<64xf32>
    %103 = vector.shape_cast %102 : vector<64xf32> to vector<64x1xf32>
    %c0_75 = arith.constant 0 : index
    %c0_76 = arith.constant 0 : index
    %104 = vector.load %arg11[%c0_75, %c0_76] : memref<1x1xf32, #tpu.memory_space<vmem>>, vector<1x1xf32>
    %105 = vector.broadcast %104 : vector<1x1xf32> to vector<64x1xf32>
    %106 = arith.addf %103, %105 : vector<64x1xf32>
    %107 = arith.negf %106 : vector<64x1xf32>
    %108 = math.exp %107 : vector<64x1xf32>
    %cst_77 = arith.constant 1.000000e+00 : f32
    %109 = vector.broadcast %cst_77 : f32 to vector<64x1xf32>
    %110 = arith.addf %109, %108 : vector<64x1xf32>
    %111 = arith.divf %109, %110 : vector<64x1xf32>
    %112 = vector.broadcast %111 : vector<64x1xf32> to vector<64x8xf32>
    %113 = arith.mulf %83, %112 : vector<64x8xf32>
    %114 = tpu.concatenate %65, %34, %113, %82 in 1 : vector<64x8xf32>, vector<64x8xf32>, vector<64x8xf32>, vector<64x8xf32> -> vector<64x32xf32>
    %115 = vector.shape_cast %114 : vector<64x32xf32> to vector<8x1x8x32xf32>
    %116 = arith.truncf %115 : vector<8x1x8x32xf32> to vector<8x1x8x32xbf16>
    %c0_78 = arith.constant 0 : index
    %c0_79 = arith.constant 0 : index
    %c0_80 = arith.constant 0 : index
    %c0_81 = arith.constant 0 : index
    %c0_82 = arith.constant 0 : index
    %117 = vector.load %arg12[%c0_78, %c0_79, %c0_80, %c0_81, %c0_82] : memref<1x8x1x8x32xbf16, #tpu.memory_space<vmem>>, vector<1x8x1x8x32xbf16>
    %118 = vector.shape_cast %117 : vector<1x8x1x8x32xbf16> to vector<8x1x8x32xbf16>
    %119 = vector.shape_cast %116 : vector<8x1x8x32xbf16> to vector<1x8x1x8x32xbf16>
    tpu.vector_store %arg12[%c0_78, %c0_79, %c0_80, %c0_81, %c0_82], %119 {strides = array<i32>} : memref<1x8x1x8x32xbf16, #tpu.memory_space<vmem>>, vector<1x8x1x8x32xbf16>,
    return
  }
  func.func @transform_0(%arg0: i32, %arg1: i32) -> (i32, i32, i32, i32) {
    %c0_i32 = arith.constant 0 : i32
    %c0_i32_0 = arith.constant 0 : i32
    %c0_i32_1 = arith.constant 0 : i32
    %c0_i32_2 = arith.constant 0 : i32
    return %arg0, %c0_i32, %c0_i32_0, %c0_i32_1 : i32, i32, i32, i32
  }
  func.func @transform_1(%arg0: i32, %arg1: i32) -> (i32, i32, i32, i32, i32) {
    %c0_i32 = arith.constant 0 : i32
    %c0_i32_0 = arith.constant 0 : i32
    %c0_i32_1 = arith.constant 0 : i32
    %c0_i32_2 = arith.constant 0 : i32
    return %arg0, %c0_i32, %arg1, %c0_i32_0, %c0_i32_1 : i32, i32, i32, i32, i32
  }
  func.func @transform_2(%arg0: i32, %arg1: i32) -> (i32, i32, i32, i32) {
    %c0_i32 = arith.constant 0 : i32
    %c0_i32_0 = arith.constant 0 : i32
    %c0_i32_1 = arith.constant 0 : i32
    %c0_i32_2 = arith.constant 0 : i32
    return %arg1, %c0_i32, %c0_i32_0, %c0_i32_1 : i32, i32, i32, i32
  }
  func.func @transform_3(%arg0: i32, %arg1: i32) -> (i32, i32) {
    %c0_i32 = arith.constant 0 : i32
    %c0_i32_0 = arith.constant 0 : i32
    %c0_i32_1 = arith.constant 0 : i32
    return %c0_i32, %c0_i32_0 : i32, i32
  }
  func.func @transform_4(%arg0: i32, %arg1: i32) -> (i32, i32) {
    %c0_i32 = arith.constant 0 : i32
    %c0_i32_0 = arith.constant 0 : i32
    %c0_i32_1 = arith.constant 0 : i32
    return %c0_i32, %c0_i32_0 : i32, i32
  }
  func.func @transform_5(%arg0: i32, %arg1: i32) -> (i32, i32) {
    %c0_i32 = arith.constant 0 : i32
    %c0_i32_0 = arith.constant 0 : i32
    %c0_i32_1 = arith.constant 0 : i32
    return %c0_i32, %c0_i32_0 : i32, i32
  }
  func.func @transform_6(%arg0: i32, %arg1: i32) -> (i32, i32) {
    %c0_i32 = arith.constant 0 : i32
    %c0_i32_0 = arith.constant 0 : i32
    %c0_i32_1 = arith.constant 0 : i32
    return %c0_i32, %c0_i32_0 : i32, i32
  }
  func.func @transform_7(%arg0: i32, %arg1: i32) -> (i32, i32) {
    %c0_i32 = arith.constant 0 : i32
    %c0_i32_0 = arith.constant 0 : i32
    %c0_i32_1 = arith.constant 0 : i32
    return %c0_i32, %c0_i32_0 : i32, i32
  }
  func.func @transform_8(%arg0: i32, %arg1: i32) -> (i32, i32) {
    %c0_i32 = arith.constant 0 : i32
    %c0_i32_0 = arith.constant 0 : i32
    %c0_i32_1 = arith.constant 0 : i32
    return %c0_i32, %c0_i32_0 : i32, i32
  }
  func.func @transform_9(%arg0: i32, %arg1: i32) -> (i32, i32) {
    %c0_i32 = arith.constant 0 : i32
    %c0_i32_0 = arith.constant 0 : i32
    %c0_i32_1 = arith.constant 0 : i32
    return %c0_i32, %c0_i32_0 : i32, i32
  }
  func.func @transform_10(%arg0: i32, %arg1: i32) -> (i32, i32, i32, i32, i32) {
    %c0_i32 = arith.constant 0 : i32
    %c0_i32_0 = arith.constant 0 : i32
    %c0_i32_1 = arith.constant 0 : i32
    %c0_i32_2 = arith.constant 0 : i32
    return %arg0, %c0_i32, %arg1, %c0_i32_0, %c0_i32_1 : i32, i32, i32, i32, i32
  }
}

module attributes {stable_mosaic.version = 11 : i64} {
  func.func @_conv3x3_bn_relu_kernel(%arg0: i32, %arg1: memref<1x16x16x16xbf16, #tpu.memory_space<vmem>>, %arg2: memref<9x8x16xbf16, #tpu.memory_space<vmem>>, %arg3: memref<8x1xf32, #tpu.memory_space<vmem>>, %arg4: memref<1x8x256xf32, #tpu.memory_space<vmem>>) attributes {dimension_semantics = [#tpu.dimension_semantics<parallel>], iteration_bounds = array<i64: 2>, scalar_prefetch = 0 : i64, scratch_operands = 0 : i64, tpu.core_type = #tpu.core_type<tc>, window_params = [{transform_indices = @transform_0, window_bounds = array<i64: 1, 16, 16, 16>}, {pipeline_mode = #tpu.pipeline_mode<synchronous>, transform_indices = @transform_1, window_bounds = array<i64: 9, 8, 16>}, {pipeline_mode = #tpu.pipeline_mode<synchronous>, transform_indices = @transform_2, window_bounds = array<i64: 8, 1>}, {transform_indices = @transform_3, window_bounds = array<i64: 1, 8, 256>}]} {
    %c0 = arith.constant 0 : index
    %c0_0 = arith.constant 0 : index
    %c0_1 = arith.constant 0 : index
    %c0_2 = arith.constant 0 : index
    %0 = vector.load %arg1[%c0, %c0_0, %c0_1, %c0_2] : memref<1x16x16x16xbf16, #tpu.memory_space<vmem>>, vector<1x16x16x16xbf16>
    %1 = vector.shape_cast %0 : vector<1x16x16x16xbf16> to vector<16x16x16xbf16>
    %cst = arith.constant 0.000000e+00 : bf16
    %2 = vector.broadcast %cst : bf16 to vector<1x16x16xbf16>
    %3 = tpu.concatenate %2, %1, %2 in 0 : vector<1x16x16xbf16>, vector<16x16x16xbf16>, vector<1x16x16xbf16> -> vector<18x16x16xbf16>
    %cst_3 = arith.constant 0.000000e+00 : bf16
    %4 = vector.broadcast %cst_3 : bf16 to vector<18x1x16xbf16>
    %5 = tpu.concatenate %4, %3, %4 in 1 : vector<18x1x16xbf16>, vector<18x16x16xbf16>, vector<18x1x16xbf16> -> vector<18x18x16xbf16>
    %cst_4 = arith.constant 0.000000e+00 : f32
    %6 = vector.broadcast %cst_4 : f32 to vector<8x256xf32>
    %7 = vector.extract_strided_slice %5 {offsets = [0, 0, 0], sizes = [16, 16, 16], strides = [1, 1, 1]} : vector<18x18x16xbf16> to vector<16x16x16xbf16>
    %8 = vector.shape_cast %7 : vector<16x16x16xbf16> to vector<256x16xbf16>
    %c0_5 = arith.constant 0 : index
    %c0_6 = arith.constant 0 : index
    %c0_7 = arith.constant 0 : index
    %9 = vector.load %arg2[%c0_5, %c0_6, %c0_7] : memref<9x8x16xbf16, #tpu.memory_space<vmem>>, vector<1x8x16xbf16>
    %10 = vector.shape_cast %9 : vector<1x8x16xbf16> to vector<8x16xbf16>
    %cst_8 = arith.constant dense<0.000000e+00> : vector<8x256xf32>
    %11 = tpu.matmul %10, %8, %cst_8 {dimension_numbers = #tpu.dot_dimension_numbers<[1], [1], [0], [0], [0, 0, 1, 0], [], []>} : vector<8x16xbf16>, vector<256x16xbf16>, vector<8x256xf32> -> vector<8x256xf32>
    %12 = arith.addf %6, %11 : vector<8x256xf32>
    %13 = vector.extract_strided_slice %5 {offsets = [0, 1, 0], sizes = [16, 16, 16], strides = [1, 1, 1]} : vector<18x18x16xbf16> to vector<16x16x16xbf16>
    %14 = vector.shape_cast %13 : vector<16x16x16xbf16> to vector<256x16xbf16>
    %c1 = arith.constant 1 : index
    %c0_9 = arith.constant 0 : index
    %c0_10 = arith.constant 0 : index
    %15 = vector.load %arg2[%c1, %c0_9, %c0_10] : memref<9x8x16xbf16, #tpu.memory_space<vmem>>, vector<1x8x16xbf16>
    %16 = vector.shape_cast %15 : vector<1x8x16xbf16> to vector<8x16xbf16>
    %cst_11 = arith.constant dense<0.000000e+00> : vector<8x256xf32>
    %17 = tpu.matmul %16, %14, %cst_11 {dimension_numbers = #tpu.dot_dimension_numbers<[1], [1], [0], [0], [0, 0, 1, 0], [], []>} : vector<8x16xbf16>, vector<256x16xbf16>, vector<8x256xf32> -> vector<8x256xf32>
    %18 = arith.addf %12, %17 : vector<8x256xf32>
    %19 = vector.extract_strided_slice %5 {offsets = [0, 2, 0], sizes = [16, 16, 16], strides = [1, 1, 1]} : vector<18x18x16xbf16> to vector<16x16x16xbf16>
    %20 = vector.shape_cast %19 : vector<16x16x16xbf16> to vector<256x16xbf16>
    %c2 = arith.constant 2 : index
    %c0_12 = arith.constant 0 : index
    %c0_13 = arith.constant 0 : index
    %21 = vector.load %arg2[%c2, %c0_12, %c0_13] : memref<9x8x16xbf16, #tpu.memory_space<vmem>>, vector<1x8x16xbf16>
    %22 = vector.shape_cast %21 : vector<1x8x16xbf16> to vector<8x16xbf16>
    %cst_14 = arith.constant dense<0.000000e+00> : vector<8x256xf32>
    %23 = tpu.matmul %22, %20, %cst_14 {dimension_numbers = #tpu.dot_dimension_numbers<[1], [1], [0], [0], [0, 0, 1, 0], [], []>} : vector<8x16xbf16>, vector<256x16xbf16>, vector<8x256xf32> -> vector<8x256xf32>
    %24 = arith.addf %18, %23 : vector<8x256xf32>
    %25 = vector.extract_strided_slice %5 {offsets = [1, 0, 0], sizes = [16, 16, 16], strides = [1, 1, 1]} : vector<18x18x16xbf16> to vector<16x16x16xbf16>
    %26 = vector.shape_cast %25 : vector<16x16x16xbf16> to vector<256x16xbf16>
    %c3 = arith.constant 3 : index
    %c0_15 = arith.constant 0 : index
    %c0_16 = arith.constant 0 : index
    %27 = vector.load %arg2[%c3, %c0_15, %c0_16] : memref<9x8x16xbf16, #tpu.memory_space<vmem>>, vector<1x8x16xbf16>
    %28 = vector.shape_cast %27 : vector<1x8x16xbf16> to vector<8x16xbf16>
    %cst_17 = arith.constant dense<0.000000e+00> : vector<8x256xf32>
    %29 = tpu.matmul %28, %26, %cst_17 {dimension_numbers = #tpu.dot_dimension_numbers<[1], [1], [0], [0], [0, 0, 1, 0], [], []>} : vector<8x16xbf16>, vector<256x16xbf16>, vector<8x256xf32> -> vector<8x256xf32>
    %30 = arith.addf %24, %29 : vector<8x256xf32>
    %31 = vector.extract_strided_slice %5 {offsets = [1, 1, 0], sizes = [16, 16, 16], strides = [1, 1, 1]} : vector<18x18x16xbf16> to vector<16x16x16xbf16>
    %32 = vector.shape_cast %31 : vector<16x16x16xbf16> to vector<256x16xbf16>
    %c4 = arith.constant 4 : index
    %c0_18 = arith.constant 0 : index
    %c0_19 = arith.constant 0 : index
    %33 = vector.load %arg2[%c4, %c0_18, %c0_19] : memref<9x8x16xbf16, #tpu.memory_space<vmem>>, vector<1x8x16xbf16>
    %34 = vector.shape_cast %33 : vector<1x8x16xbf16> to vector<8x16xbf16>
    %cst_20 = arith.constant dense<0.000000e+00> : vector<8x256xf32>
    %35 = tpu.matmul %34, %32, %cst_20 {dimension_numbers = #tpu.dot_dimension_numbers<[1], [1], [0], [0], [0, 0, 1, 0], [], []>} : vector<8x16xbf16>, vector<256x16xbf16>, vector<8x256xf32> -> vector<8x256xf32>
    %36 = arith.addf %30, %35 : vector<8x256xf32>
    %37 = vector.extract_strided_slice %5 {offsets = [1, 2, 0], sizes = [16, 16, 16], strides = [1, 1, 1]} : vector<18x18x16xbf16> to vector<16x16x16xbf16>
    %38 = vector.shape_cast %37 : vector<16x16x16xbf16> to vector<256x16xbf16>
    %c5 = arith.constant 5 : index
    %c0_21 = arith.constant 0 : index
    %c0_22 = arith.constant 0 : index
    %39 = vector.load %arg2[%c5, %c0_21, %c0_22] : memref<9x8x16xbf16, #tpu.memory_space<vmem>>, vector<1x8x16xbf16>
    %40 = vector.shape_cast %39 : vector<1x8x16xbf16> to vector<8x16xbf16>
    %cst_23 = arith.constant dense<0.000000e+00> : vector<8x256xf32>
    %41 = tpu.matmul %40, %38, %cst_23 {dimension_numbers = #tpu.dot_dimension_numbers<[1], [1], [0], [0], [0, 0, 1, 0], [], []>} : vector<8x16xbf16>, vector<256x16xbf16>, vector<8x256xf32> -> vector<8x256xf32>
    %42 = arith.addf %36, %41 : vector<8x256xf32>
    %43 = vector.extract_strided_slice %5 {offsets = [2, 0, 0], sizes = [16, 16, 16], strides = [1, 1, 1]} : vector<18x18x16xbf16> to vector<16x16x16xbf16>
    %44 = vector.shape_cast %43 : vector<16x16x16xbf16> to vector<256x16xbf16>
    %c6 = arith.constant 6 : index
    %c0_24 = arith.constant 0 : index
    %c0_25 = arith.constant 0 : index
    %45 = vector.load %arg2[%c6, %c0_24, %c0_25] : memref<9x8x16xbf16, #tpu.memory_space<vmem>>, vector<1x8x16xbf16>
    %46 = vector.shape_cast %45 : vector<1x8x16xbf16> to vector<8x16xbf16>
    %cst_26 = arith.constant dense<0.000000e+00> : vector<8x256xf32>
    %47 = tpu.matmul %46, %44, %cst_26 {dimension_numbers = #tpu.dot_dimension_numbers<[1], [1], [0], [0], [0, 0, 1, 0], [], []>} : vector<8x16xbf16>, vector<256x16xbf16>, vector<8x256xf32> -> vector<8x256xf32>
    %48 = arith.addf %42, %47 : vector<8x256xf32>
    %49 = vector.extract_strided_slice %5 {offsets = [2, 1, 0], sizes = [16, 16, 16], strides = [1, 1, 1]} : vector<18x18x16xbf16> to vector<16x16x16xbf16>
    %50 = vector.shape_cast %49 : vector<16x16x16xbf16> to vector<256x16xbf16>
    %c7 = arith.constant 7 : index
    %c0_27 = arith.constant 0 : index
    %c0_28 = arith.constant 0 : index
    %51 = vector.load %arg2[%c7, %c0_27, %c0_28] : memref<9x8x16xbf16, #tpu.memory_space<vmem>>, vector<1x8x16xbf16>
    %52 = vector.shape_cast %51 : vector<1x8x16xbf16> to vector<8x16xbf16>
    %cst_29 = arith.constant dense<0.000000e+00> : vector<8x256xf32>
    %53 = tpu.matmul %52, %50, %cst_29 {dimension_numbers = #tpu.dot_dimension_numbers<[1], [1], [0], [0], [0, 0, 1, 0], [], []>} : vector<8x16xbf16>, vector<256x16xbf16>, vector<8x256xf32> -> vector<8x256xf32>
    %54 = arith.addf %48, %53 : vector<8x256xf32>
    %55 = vector.extract_strided_slice %5 {offsets = [2, 2, 0], sizes = [16, 16, 16], strides = [1, 1, 1]} : vector<18x18x16xbf16> to vector<16x16x16xbf16>
    %56 = vector.shape_cast %55 : vector<16x16x16xbf16> to vector<256x16xbf16>
    %c8 = arith.constant 8 : index
    %c0_30 = arith.constant 0 : index
    %c0_31 = arith.constant 0 : index
    %57 = vector.load %arg2[%c8, %c0_30, %c0_31] : memref<9x8x16xbf16, #tpu.memory_space<vmem>>, vector<1x8x16xbf16>
    %58 = vector.shape_cast %57 : vector<1x8x16xbf16> to vector<8x16xbf16>
    %cst_32 = arith.constant dense<0.000000e+00> : vector<8x256xf32>
    %59 = tpu.matmul %58, %56, %cst_32 {dimension_numbers = #tpu.dot_dimension_numbers<[1], [1], [0], [0], [0, 0, 1, 0], [], []>} : vector<8x16xbf16>, vector<256x16xbf16>, vector<8x256xf32> -> vector<8x256xf32>
    %60 = arith.addf %54, %59 : vector<8x256xf32>
    %c0_33 = arith.constant 0 : index
    %c0_34 = arith.constant 0 : index
    %61 = vector.load %arg3[%c0_33, %c0_34] : memref<8x1xf32, #tpu.memory_space<vmem>>, vector<8x1xf32>
    %62 = vector.broadcast %61 : vector<8x1xf32> to vector<8x256xf32>
    %63 = arith.addf %60, %62 : vector<8x256xf32>
    %cst_35 = arith.constant 0.000000e+00 : f32
    %64 = vector.broadcast %cst_35 : f32 to vector<8x256xf32>
    %65 = arith.maximumf %63, %64 : vector<8x256xf32>
    %c0_36 = arith.constant 0 : index
    %c0_37 = arith.constant 0 : index
    %c0_38 = arith.constant 0 : index
    %66 = vector.load %arg4[%c0_36, %c0_37, %c0_38] : memref<1x8x256xf32, #tpu.memory_space<vmem>>, vector<1x8x256xf32>
    %67 = vector.shape_cast %66 : vector<1x8x256xf32> to vector<8x256xf32>
    %68 = vector.shape_cast %65 : vector<8x256xf32> to vector<1x8x256xf32>
    tpu.vector_store %arg4[%c0_36, %c0_37, %c0_38], %68 {strides = array<i32>} : memref<1x8x256xf32, #tpu.memory_space<vmem>>, vector<1x8x256xf32>,
    return
  }
  func.func @transform_0(%arg0: i32) -> (i32, i32, i32, i32) {
    %c0_i32 = arith.constant 0 : i32
    %c0_i32_0 = arith.constant 0 : i32
    %c0_i32_1 = arith.constant 0 : i32
    %c0_i32_2 = arith.constant 0 : i32
    return %arg0, %c0_i32, %c0_i32_0, %c0_i32_1 : i32, i32, i32, i32
  }
  func.func @transform_1(%arg0: i32) -> (i32, i32, i32) {
    %c0_i32 = arith.constant 0 : i32
    %c0_i32_0 = arith.constant 0 : i32
    %c0_i32_1 = arith.constant 0 : i32
    %c0_i32_2 = arith.constant 0 : i32
    return %c0_i32, %c0_i32_0, %c0_i32_1 : i32, i32, i32
  }
  func.func @transform_2(%arg0: i32) -> (i32, i32) {
    %c0_i32 = arith.constant 0 : i32
    %c0_i32_0 = arith.constant 0 : i32
    %c0_i32_1 = arith.constant 0 : i32
    return %c0_i32, %c0_i32_0 : i32, i32
  }
  func.func @transform_3(%arg0: i32) -> (i32, i32, i32) {
    %c0_i32 = arith.constant 0 : i32
    %c0_i32_0 = arith.constant 0 : i32
    %c0_i32_1 = arith.constant 0 : i32
    return %arg0, %c0_i32, %c0_i32_0 : i32, i32, i32
  }
}

</mosaic_0001>

<bundles_post_ra>
// kernel: decoder_block_forward.3
= control target key start
LH: loop header
LB: loop body
LE: loop exit
PB: predicated region body
PF: predicated region fallthrough
CT: control target
= control target key end

     0   :  { %s1731_s12 = smov 0   ;;  %s2440_s0 = inlined_call_operand.vmem [shape: bf16[2,16,16,16], index: 0, kind: input, shape index: {}]   ;;  %s2441_s1 = inlined_call_operand.vmem [shape: bf16[9,8,16], index: 1, kind: input, shape index: {}]   ;;  %s2442_s2 = inlined_call_operand.vmem [shape: f32[8,1], index: 2, kind: input, shape index: {}]   ;;  %s2443_s3 = inlined_call_operand.vmem [shape: f32[2,8,256], index: 3, kind: output, shape index: {}]  }
   0x1 LB: > { %s1396_s13 = sadd.s32 4294967295, %s1708_s12   ;;  %p1400_p0 = scmp.ge.s32.totalorder %s1708_s12, 1  ;;  %s1708_s12 = sphi %s1731_s12, %s13_s12  }
   0x2   : > { %p137_p1 = scmp.lt.s32.totalorder %s1708_s12, 3 }
   0x4   : > { %p138_p2 = pnand %p1400_p0, %p137_p1 }
   0x6   : > { %141 = sbr.rel (%p138_p2) target bundleno = 573 (0x23d), region = 32 }
   0xd   : > { %p161_p3 = scmp.lt.s32.totalorder %s1396_s13, 1  ;;  %vm437_vm0 = vcmask 1040384   ;;  %vm438_vm1 = vsmask.f32 256  ;;  %vm670_vm3 = vcmask 130048   ;;  %v1710_v3 = vmov 0  }
   0xe   : > { %vm1739_vm2 = vmand %vm437_vm0, %vm438_vm1  ;;  %v1746_v1 = vld [vmem:[%s2441_s1 + $0x4] sm:$0xf]  ;;  %v1751_v2 = vld [vmem:[%s2441_s1] sm:$0xf]  ;;  %v287_v4 = vrot.slane %v1710_v3, 7  ;;  %1685 = vset.pattern.permute.xlu0 %v1710_v3  ;;  %vm871_vm5 = vcmask 1046528  }
   0xf   : > { %s2465_s13 = smov (!%p161_p3, %s1396_s13), 1  ;;  %1458 = vmatprep.mubr.msk.bf16.mxu0 %vm670_vm3, %v1746_v1  ;;  %1476 = vmatprep.mubr.msk.bf16.mxu1 %vm670_vm3, %v1751_v2  ;;  %vm475_vm4 = vsmask.f32 7424 }
  0x10   : > { %s1440_s18 = sshll.u32 %s2465_s13, 7  ;;  %v1762_v5 = vsel %vm1739_vm2, 0, %v287_v4  ;;  %v1766_v6 = vsel %vm1739_vm2, %v287_v4, 0  ;;  %s1441_s11 = sshll.u32 %s2465_s13, 4 }
  0x11   : > { %s1771_s21 = scalar_lea.vmem %s2440_s0, %s1440_s18  ;;  %v477_v7 = vshrl.u32 %v1762_v5, 16  ;;  %v479_v8 = vshll.u32 %v1762_v5, 16  ;;  %v484_v9 = vshll.u32 %v1766_v6, 16  ;;  %v766_v24 = vsel %vm670_vm3, %v1762_v5, 0  ;;  %s170_s16 = scalar_lea.vmem %s2443_s3, %s1441_s11 }
  0x12   : > { %v1686_v10 = vld [vmem:[%s1771_s21 + $0x38] sm:$0xff]   ;;  %v1687_v15 = vld [vmem:[%s1771_s21 + $0x40] sm:$0xff]   ;;  %v1689_v22 = vld [vmem:[%s1771_s21 + $0x48] sm:$0xff]  }
  0x13   : > { %v481_v11 = vrot.slane %v479_v8, 1  ;;  %v486_v12 = vrot.slane %v484_v9, 1  ;;  %v341_v13 = vshrl.u32 %v1686_v10, 16  ;;  %v344_v14 = vshll.u32 %v1686_v10, 16  ;;  %v1688_v16 = vld [vmem:[%s1771_s21] sm:$0xff]   ;;  %v1690_v45 = vld [vmem:[%s1771_s21 + $0x8] sm:$0xff]  }
  0x14   : > { %v348_v19 = vshrl.u32 %v1687_v15, 16  ;;  %v351_v20 = vshll.u32 %v1687_v15, 16  ;;  %v292_v21 = vshrl.u32 %v1688_v16, 16  ;;  %v295_v28 = vshll.u32 %v1688_v16, 16  ;;  %v1691_v54 = vld [vmem:[%s1771_s21 + $0x50] sm:$0xff]   ;;  %v1837_v63 = vld [vmem:[%s1771_s21 + $0x58] sm:$0xff]  }
  0x15   : > { %v482_v17 = vor.u32 %v481_v11, %v477_v7  ;;  %v343_v18 = vrot.slane %v341_v13, 7  ;;  %v355_v32 = vshrl.u32 %v1689_v22, 16  ;;  %v358_v36 = vshll.u32 %v1689_v22, 16  ;;  %v1692_v59 = vld [vmem:[%s1771_s21 + $0x10] sm:$0xff]  }
  0x16   : > { %v350_v27 = vrot.slane %v348_v19, 7  ;;  %v294_v31 = vrot.slane %v292_v21, 7  ;;  %v302_v15 = vshll.u32 %v1690_v45, 16  ;;  %v362_v16 = vshrl.u32 %v1691_v54, 16 }
  0x17   : > { %v1781_v23 = vsel %vm475_vm4, %v482_v17, %v486_v12  ;;  %v346_v25 = vor.u32 %v344_v14, %v343_v18  ;;  %v1787_v26 = vsel %vm1739_vm2, %v343_v18, 0  ;;  %v357_v44 = vrot.slane %v355_v32, 7 }
  0x18   : > { %2454 = vst [vmem:[#allocation2_spill] sm:$0xff] %v1781_v23  ;;  %v580_v29 = vshll.u32 %v1787_v26, 16  ;;  %v675_v30 = vsel %vm670_vm3, %v1781_v23, 0  ;;  %v353_v34 = vor.u32 %v351_v20, %v350_v27  ;;  %v1798_v35 = vsel %vm1739_vm2, %v350_v27, 0 }
  0x19   : > { %v1794_v33 = vsel %vm1739_vm2, 0, %v346_v25  ;;  %v592_v40 = vshll.u32 %v1798_v35, 16  ;;  %v297_v42 = vor.u32 %v295_v28, %v294_v31  ;;  %v1811_v43 = vsel %vm1739_vm2, %v294_v31, 0 }
  0x1a   : > { %v573_v37 = vshrl.u32 %v1794_v33, 16  ;;  %v575_v38 = vshll.u32 %v1794_v33, 16  ;;  %v582_v39 = vrot.slane %v580_v29, 1  ;;  %1612 = vmatprep.subr.msk.bf16.mxu1 %vm670_vm3, %v1794_v33  ;;  %v1807_v41 = vsel %vm1739_vm2, 0, %v353_v34 }
  0x1b   : > { %1461 = vmatpush3.bf16.xpose.msra.mxu1 %v766_v24  ;;  %v585_v47 = vshrl.u32 %v1807_v41, 16  ;;  %v587_v48 = vshll.u32 %v1807_v41, 16  ;;  %v594_v49 = vrot.slane %v592_v40, 1  ;;  %v1820_v50 = vsel %vm1739_vm2, 0, %v297_v42  ;;  %v1694_v42 = vld [vmem:[%s1771_s21 + $0x18] sm:$0xff]  }
  0x1c   : > { %v577_v46 = vrot.slane %v575_v38, 1  ;;  %1613 = vmatprep.subr.msk.bf16.mxu1 %vm670_vm3, %v1807_v41  ;;  %v496_v51 = vshll.u32 %v1811_v43, 16  ;;  %v360_v52 = vor.u32 %v358_v36, %v357_v44  ;;  %v1825_v53 = vsel %vm1739_vm2, %v357_v44, 0 }
  0x1d   : > { %v589_v56 = vrot.slane %v587_v48, 1  ;;  %v489_v57 = vshrl.u32 %v1820_v50, 16  ;;  %v491_v58 = vshll.u32 %v1820_v50, 16  ;;  %v604_v62 = vshll.u32 %v1825_v53, 16 }
  0x1e   : > { %v578_v55 = vor.u32 %v577_v46, %v573_v37  ;;  %v498_v60 = vrot.slane %v496_v51, 1  ;;  %v1833_v61 = vsel %vm1739_vm2, 0, %v360_v52  ;;  %v1844_v8 = vsel %vm670_vm3, %v1820_v50, 0 }
  0x1f   : > { %v590_v4 = vor.u32 %v589_v56, %v585_v47  ;;  %v493_v7 = vrot.slane %v491_v58, 1  ;;  %v597_v9 = vshrl.u32 %v1833_v61, 16  ;;  %v599_v10 = vshll.u32 %v1833_v61, 16 }
  0x20   : > { %v1840_v3 = vsel %vm475_vm4, %v578_v55, %v582_v39  ;;  %v606_v11 = vrot.slane %v604_v62, 1  ;;  %v299_v12 = vshrl.u32 %v1690_v45, 16  ;;  %v365_v19 = vshll.u32 %v1691_v54, 16 }
  0x21   : > { %2455 = vst [vmem:[#allocation3_spill] sm:$0xff] %v1840_v3  ;;  %1604 = vmatprep.subr.msk.bf16.mxu0 %vm670_vm3, %v1840_v3  ;;  %v1851_v13 = vsel %vm475_vm4, %v590_v4, %v594_v49  ;;  %v494_v14 = vor.u32 %v493_v7, %v489_v57  ;;  %v601_v17 = vrot.slane %v599_v10, 1  ;;  %v306_v20 = vshrl.u32 %v1692_v59, 16 }
  0x22   : > { %1443 = vmatpush3.bf16.xpose.msra.mxu0 %v675_v30  ;;  %v301_v18 = vrot.slane %v299_v12, 7  ;;  %v364_v22 = vrot.slane %v362_v16, 7  ;;  %v309_v24 = vshll.u32 %v1692_v59, 16  ;;  %v369_v25 = vshrl.u32 %v1837_v63, 16 }
  0x23   : > { %1605 = vmatprep.subr.msk.bf16.mxu0 %vm670_vm3, %v1851_v13  ;;  %1463 = vmatpush3.bf16.xpose.msra.mxu1 %v1844_v8  ;;  %v499_v21 = vsel %vm475_vm4, %v494_v14, %v498_v60  ;;  %v602_v28 = vor.u32 %v601_v17, %v597_v9  ;;  %v308_v36 = vrot.slane %v306_v20, 7  ;;  %v372_v59 = vshll.u32 %v1837_v63, 16  ;;  %v1695_v14 = vld [vmem:[%s1771_s21 + $0x60] sm:$0xff]  }
  0x24   : > { %1614 = vmatprep.subr.msk.bf16.mxu1 %vm670_vm3, %v1833_v61  ;;  %v1861_v27 = vsel %vm670_vm3, %v499_v21, 0  ;;  %v304_v29 = vor.u32 %v302_v15, %v301_v18  ;;  %v1865_v30 = vsel %vm1739_vm2, %v301_v18, 0  ;;  %v367_v32 = vor.u32 %v365_v19, %v364_v22  ;;  %v1696_v19 = vld [vmem:[%s1771_s21 + $0x20] sm:$0xff]  }
  0x25   : > { %v508_v31 = vshll.u32 %v1865_v30, 16  ;;  %v1870_v34 = vsel %vm1739_vm2, %v364_v22, 0  ;;  %v1873_v37 = vsel %vm475_vm4, %v602_v28, %v606_v11  ;;  %v371_v40 = vrot.slane %v369_v25, 7 }
  0x26   : > { %v1877_v38 = vsel %vm1739_vm2, 0, %v304_v29  ;;  %v616_v39 = vshll.u32 %v1870_v34, 16  ;;  %v1889_v48 = vsel %vm1739_vm2, 0, %v367_v32  ;;  %v311_v51 = vor.u32 %v309_v24, %v308_v36 }
  0x27   : > { %v501_v44 = vshrl.u32 %v1877_v38, 16  ;;  %v503_v45 = vshll.u32 %v1877_v38, 16  ;;  %v510_v46 = vrot.slane %v508_v31, 1  ;;  %v1885_v47 = vsel %vm670_vm3, %v1877_v38, 0 }
  0x28   : > { %v618_v49 = vrot.slane %v616_v39, 1  ;;  %v1893_v52 = vsel %vm1739_vm2, %v308_v36, 0  ;;  %v609_v55 = vshrl.u32 %v1889_v48, 16  ;;  %v611_v56 = vshll.u32 %v1889_v48, 16 }
  0x29   : > { %v505_v54 = vrot.slane %v503_v45, 1  ;;  %v520_v57 = vshll.u32 %v1893_v52, 16  ;;  %v1904_v58 = vsel %vm1739_vm2, 0, %v311_v51  ;;  %v1909_v60 = vsel %vm1739_vm2, %v371_v40, 0 }
  0x2a   : > { %1445 = vmatpush3.bf16.xpose.msra.mxu0 %v1861_v27  ;;  %v313_v62 = vshrl.u32 %v1694_v42, 16  ;;  %v613_v7 = vrot.slane %v611_v56, 1  ;;  %v513_v9 = vshrl.u32 %v1904_v58, 16  ;;  %v515_v10 = vshll.u32 %v1904_v58, 16 }
  0x2b   : > { %1606 = vmatprep.subr.msk.bf16.mxu0 %vm670_vm3, %v1873_v37  ;;  %1465 = vmatpush3.bf16.xpose.msra.mxu1 %v1885_v47  ;;  %v506_v4 = vor.u32 %v505_v54, %v501_v44  ;;  %v522_v11 = vrot.slane %v520_v57, 1  ;;  %v1917_v12 = vsel %vm670_vm3, %v1904_v58, 0  ;;  %v374_v63 = vor.u32 %v372_v59, %v371_v40 }
  0x2c   : > { %1615 = vmatprep.subr.msk.bf16.mxu1 %vm670_vm3, %v1889_v48  ;;  %v614_v16 = vor.u32 %v613_v7, %v609_v55  ;;  %v517_v17 = vrot.slane %v515_v10, 1  ;;  %v315_v18 = vrot.slane %v313_v62, 7  ;;  %v628_v22 = vshll.u32 %v1909_v60, 16 }
  0x2d   : > { %v511_v15 = vsel %vm475_vm4, %v506_v4, %v510_v46  ;;  %v1927_v21 = vsel %vm1739_vm2, 0, %v374_v63  ;;  %v316_v24 = vshll.u32 %v1694_v42, 16  ;;  %v376_v39 = vshrl.u32 %v1695_v14, 16  ;;  %v1698_v63 = vld [vmem:[%s1771_s21 + $0x28] sm:$0xff]  }
  0x2e   : > { %v1923_v20 = vsel %vm670_vm3, %v511_v15, 0  ;;  %v1931_v25 = vsel %vm475_vm4, %v614_v16, %v618_v49  ;;  %v518_v28 = vor.u32 %v517_v17, %v513_v9  ;;  %v621_v29 = vshrl.u32 %v1927_v21, 16  ;;  %v1697_v49 = vld [vmem:[%s1771_s21 + $0x68] sm:$0xff]  }
  0x2f   : > { %v623_v31 = vshll.u32 %v1927_v21, 16  ;;  %v318_v32 = vor.u32 %v316_v24, %v315_v18  ;;  %v1937_v36 = vsel %vm1739_vm2, %v315_v18, 0  ;;  %v379_v40 = vshll.u32 %v1695_v14, 16 }
  0x30   : > { %v523_v44 = vsel %vm475_vm4, %v518_v28, %v522_v11  ;;  %v532_v45 = vshll.u32 %v1937_v36, 16  ;;  %v320_v46 = vshrl.u32 %v1696_v19, 16  ;;  %v630_v51 = vrot.slane %v628_v22, 1 }
  0x31   : > { %v625_v42 = vrot.slane %v623_v31, 1  ;;  %v1948_v54 = vsel %vm1739_vm2, 0, %v318_v32  ;;  %v378_v55 = vrot.slane %v376_v39, 7  ;;  %v323_v56 = vshll.u32 %v1696_v19, 16 }
  0x32   : > { %1447 = vmatpush3.bf16.xpose.msra.mxu0 %v1923_v20  ;;  %v1951_v57 = vsel %vm670_vm3, %v523_v44, 0  ;;  %v525_v62 = vshrl.u32 %v1948_v54, 16  ;;  %v527_v4 = vshll.u32 %v1948_v54, 16  ;;  %v534_v7 = vrot.slane %v532_v45, 1 }
  0x33   : > { %1607 = vmatprep.subr.msk.bf16.mxu0 %vm670_vm3, %v1931_v25  ;;  %1467 = vmatpush3.bf16.xpose.msra.mxu1 %v1917_v12  ;;  %v626_v59 = vor.u32 %v625_v42, %v621_v29  ;;  %v381_v9 = vor.u32 %v379_v40, %v378_v55  ;;  %v1959_v10 = vsel %vm1739_vm2, %v378_v55, 0  ;;  %v322_v11 = vrot.slane %v320_v46, 7  ;;  %v1699_v42 = vld [vmem:[%s1771_s21 + $0x70] sm:$0xff]  }
  0x34   : > { %1616 = vmatprep.subr.msk.bf16.mxu1 %vm670_vm3, %v1927_v21  ;;  %v529_v14 = vrot.slane %v527_v4, 1  ;;  %v1964_v15 = vsel %vm670_vm3, %v1948_v54, 0  ;;  %v640_v16 = vshll.u32 %v1959_v10, 16  ;;  %v383_v17 = vshrl.u32 %v1697_v49, 16 }
  0x35   : > { %v1969_v18 = vsel %vm1739_vm2, 0, %v381_v9  ;;  %v325_v19 = vor.u32 %v323_v56, %v322_v11  ;;  %v1973_v22 = vsel %vm1739_vm2, %v322_v11, 0  ;;  %v386_v24 = vshll.u32 %v1697_v49, 16 }
  0x36   : > { %v1976_v28 = vsel %vm475_vm4, %v626_v59, %v630_v51  ;;  %v530_v29 = vor.u32 %v529_v14, %v525_v62  ;;  %v633_v31 = vshrl.u32 %v1969_v18, 16  ;;  %v635_v32 = vshll.u32 %v1969_v18, 16 }
  0x37   : > { %2456 = vst [vmem:[#allocation4_spill] sm:$0xff] %v1976_v28  ;;  %v1982_v39 = vsel %vm1739_vm2, 0, %v325_v19  ;;  %v385_v40 = vrot.slane %v383_v17, 7  ;;  %v327_v44 = vshrl.u32 %v1698_v63, 16  ;;  %v544_v51 = vshll.u32 %v1973_v22, 16 }
  0x38   : > { %v637_v45 = vrot.slane %v635_v32, 1  ;;  %v537_v46 = vshrl.u32 %v1982_v39, 16  ;;  %v539_v49 = vshll.u32 %v1982_v39, 16  ;;  %v535_v55 = vsel %vm475_vm4, %v530_v29, %v534_v7 }
  0x39   : > { %v642_v56 = vrot.slane %v640_v16, 1  ;;  %v388_v59 = vor.u32 %v386_v24, %v385_v40  ;;  %v1997_v9 = vsel %vm1739_vm2, %v385_v40, 0  ;;  %v329_v11 = vrot.slane %v327_v44, 7  ;;  %v1700_v16 = vld [vmem:[%s1771_s21 + $0x30] sm:$0xff]  }
  0x3a   : > { %1449 = vmatpush3.bf16.xpose.msra.mxu0 %v1951_v57  ;;  %v638_v62 = vor.u32 %v637_v45, %v633_v31  ;;  %v541_v4 = vrot.slane %v539_v49, 1  ;;  %v652_v7 = vshll.u32 %v1997_v9, 16  ;;  %v330_v17 = vshll.u32 %v1698_v63, 16 }
  0x3b   : > { %1608 = vmatprep.subr.msk.bf16.mxu0 %vm670_vm3, %v1976_v28  ;;  %1469 = vmatpush3.bf16.xpose.msra.mxu1 %v1964_v15  ;;  %v2001_v14 = vsel %vm1739_vm2, 0, %v388_v59  ;;  %v390_v19 = vshrl.u32 %v1699_v42, 16  ;;  %v2006_v24 = vsel %vm670_vm3, %v535_v55, 0  ;;  %v546_v31 = vrot.slane %v544_v51, 1 }
  0x3c   : > { %1617 = vmatprep.subr.msk.bf16.mxu1 %vm670_vm3, %v1969_v18  ;;  %2457 = vst [vmem:[#allocation5_spill] sm:$0xff] %v2006_v24  ;;  %v542_v29 = vor.u32 %v541_v4, %v537_v46  ;;  %v647_v32 = vshll.u32 %v2001_v14, 16  ;;  %v645_v40 = vshrl.u32 %v2001_v14, 16  ;;  %v332_v45 = vor.u32 %v330_v17, %v329_v11 }
  0x3d   : > { %v2012_v44 = vsel %vm1739_vm2, %v329_v11, 0  ;;  %v392_v49 = vrot.slane %v390_v19, 7  ;;  %v2015_v59 = vsel %vm475_vm4, %v638_v62, %v642_v56  ;;  %v2019_v63 = vsel %vm670_vm3, %v1982_v39, 0 }
  0x3e   : > { %2458 = vst [vmem:[#allocation6_spill] sm:$0xff] %v2015_v59  ;;  %v649_v55 = vrot.slane %v647_v32, 1  ;;  %v393_v46 = vshll.u32 %v1699_v42, 16  ;;  %v654_v51 = vrot.slane %v652_v7, 1  ;;  %v2023_v4 = vsel %vm1739_vm2, 0, %v332_v45 }
  0x3f   : > { %v334_v17 = vshrl.u32 %v1700_v16, 16  ;;  %v547_v11 = vsel %vm475_vm4, %v542_v29, %v546_v31  ;;  %v551_v19 = vshll.u32 %v2023_v4, 16  ;;  %v556_v56 = vshll.u32 %v2012_v44, 16 }
  0x40   : > { %v2031_v62 = vsel %vm1739_vm2, %v392_v49, 0  ;;  %v650_v42 = vor.u32 %v649_v55, %v645_v40  ;;  %v549_v7 = vshrl.u32 %v2023_v4, 16  ;;  %v395_v32 = vor.u32 %v393_v46, %v392_v49 }
  0x41   : > { %v336_v45 = vrot.slane %v334_v17, 7  ;;  %v553_v29 = vrot.slane %v551_v19, 1  ;;  %v337_v31 = vshll.u32 %v1700_v16, 16  ;;  %v2044_v3 = vsel %vm670_vm3, %v547_v11, 0 }
  0x42   : > { %1451 = vmatpush3.bf16.xpose.msra.mxu0 %v2006_v24  ;;  %v2041_v23 = vsel %vm1739_vm2, 0, %v395_v32  ;;  %v664_v40 = vshll.u32 %v2031_v62, 16  ;;  %v2049_v49 = vsel %vm475_vm4, %v650_v42, %v654_v51  ;;  %v558_v17 = vrot.slane %v556_v56, 1 }
  0x43   : > { %1609 = vmatprep.subr.msk.bf16.mxu0 %vm670_vm3, %v2015_v59  ;;  %1471 = vmatpush3.bf16.xpose.msra.mxu1 %v2019_v63  ;;  %v659_v59 = vshll.u32 %v2041_v23, 16  ;;  %v339_v55 = vor.u32 %v337_v31, %v336_v45  ;;  %v554_v46 = vor.u32 %v553_v29, %v549_v7  ;;  %v2053_v16 = vsel %vm670_vm3, %v2023_v4, 0 }
  0x44   : > { %1618 = vmatprep.subr.msk.bf16.mxu1 %vm670_vm3, %v2001_v14  ;;  %v657_v19 = vshrl.u32 %v2041_v23, 16  ;;  %v464_v24 = vsel %vm1739_vm2, %v336_v45, 0  ;;  %v666_v51 = vrot.slane %v664_v40, 1  ;;  %v875_v56 = vrot.slane %v1820_v50, 1 }
  0x45   : > { %v661_v32 = vrot.slane %v659_v59, 1  ;;  %v447_v11 = vsel %vm1739_vm2, 0, %v339_v55  ;;  %v559_v42 = vsel %vm475_vm4, %v554_v46, %v558_v17  ;;  %v568_v7 = vshll.u32 %v464_v24, 16 }
  0x46   : > { %v563_v28 = vshll.u32 %v447_v11, 16  ;;  %v561_v59 = vshrl.u32 %v447_v11, 16  ;;  %v876_v29 = vrot.slane %v1811_v43, 1  ;;  %v878_v40 = vrot.slane %v1877_v38, 1 }
  0x47   : > { %v662_v31 = vor.u32 %v661_v32, %v657_v19  ;;  %v879_v50 = vrot.slane %v1865_v30, 1  ;;  %v881_v17 = vrot.slane %v1904_v58, 1  ;;  %v2079_v43 = vsel %vm670_vm3, %v559_v42, 0 }
  0x48   : > { %v565_v45 = vrot.slane %v563_v28, 1  ;;  %v2072_v55 = vsel %vm871_vm5, %v875_v56, %v876_v29  ;;  %v570_v19 = vrot.slane %v568_v7, 1  ;;  %v882_v32 = vrot.slane %v1893_v52, 1  ;;  %v1701_v7 = vld [vmem:[%s1771_s21 + $0x78] sm:$0xff]  }
  0x49   : > { %v2075_v46 = vsel %vm871_vm5, %v878_v40, %v879_v50  ;;  %v2083_v28 = vsel %vm475_vm4, %v662_v31, %v666_v51  ;;  %v2086_v30 = vsel %vm670_vm3, %v447_v11, 0  ;;  %v884_v56 = vrot.slane %v1948_v54, 1 }
  0x4a   : > { %1453 = vmatpush3.bf16.xpose.msra.mxu0 %v2044_v3  ;;  %v566_v38 = vor.u32 %v565_v45, %v561_v59  ;;  %v2090_v29 = vsel %vm871_vm5, %v881_v17, %v882_v32  ;;  %v885_v58 = vrot.slane %v1937_v36, 1  ;;  %v887_v42 = vrot.slane %v1982_v39, 1 }
  0x4b   : > { %1610 = vmatprep.subr.msk.bf16.mxu0 %vm670_vm3, %v2049_v49  ;;  %1473 = vmatpush3.bf16.xpose.msra.mxu1 %v2053_v16  ;;  %v888_v52 = vrot.slane %v1973_v22, 1  ;;  %v897_v51 = vrot.slane %v1787_v26, 1  ;;  %v896_v54 = vrot.slane %v1794_v33, 1  ;;  %v890_v26 = vrot.slane %v2023_v4, 1 }
  0x4c   : > { %1619 = vmatprep.subr.msk.bf16.mxu1 %vm670_vm3, %v2041_v23  ;;  %v2103_v59 = vsel %vm871_vm5, %v884_v56, %v885_v58  ;;  %v571_v36 = vsel %vm475_vm4, %v566_v38, %v570_v19  ;;  %v891_v39 = vrot.slane %v2012_v44, 1  ;;  %v893_v45 = vrot.slane %v447_v11, 1 }
  0x4d   : > { %v2109_v22 = vsel %vm871_vm5, %v887_v42, %v888_v52  ;;  %v894_v40 = vrot.slane %v464_v24, 1  ;;  %v397_v50 = vshrl.u32 %v1701_v7, 16  ;;  %v873_v17 = vrot.slane %v1766_v6, 1  ;;  %v2130_v24 = vld [vmem:[%s2441_s1 + $0xc] sm:$0xf] }
  0x4e   : > { %v2114_v31 = vsel %vm871_vm5, %v890_v26, %v891_v39  ;;  %v2118_v19 = vsel %vm670_vm3, %v571_v36, 0  ;;  %v400_v32 = vshll.u32 %v1701_v7, 16  ;;  %v2121_v38 = vsel %vm871_vm5, %v896_v54, %v897_v51  ;;  %v2162_v54 = vld [vmem:[%s2441_s1 + $0x8] sm:$0xf] }
  0x4f   : > { %v872_v56 = vrot.slane %v1762_v5, 1  ;;  %v2125_v4 = vsel %vm871_vm5, %v893_v45, %v894_v40  ;;  %v399_v44 = vrot.slane %v397_v50, 7  ;;  %v899_v52 = vrot.slane %v1807_v41, 1 }
  0x50   : > { %v900_v7 = vrot.slane %v1798_v35, 1  ;;  %v902_v36 = vrot.slane %v1833_v61, 1  ;;  %v903_v26 = vrot.slane %v1825_v53, 1  ;;  %v929_v39 = vsel %vm670_vm3, %v2072_v55, 0 }
  0x51   : > { %v402_v6 = vor.u32 %v400_v32, %v399_v44  ;;  %v2137_v11 = vsel %vm1739_vm2, %v399_v44, 0  ;;  %v2144_v42 = vsel %vm871_vm5, %v872_v56, %v873_v17  ;;  %v905_v45 = vrot.slane %v1889_v48, 1 }
  0x52   : > { %1455 = vmatpush3.bf16.xpose.msra.mxu0 %v2079_v43  ;;  %v1132_v58 = vrot.slane %v2137_v11, 1  ;;  %v926_v51 = vsel %vm670_vm3, %v2144_v42, 0  ;;  %v2168_v0 = vsel %vm871_vm5, %v899_v52, %v900_v7  ;;  %v906_v40 = vrot.slane %v1870_v34, 1 }
  0x53   : > { %1611 = vmatprep.subr.msk.bf16.mxu0 %vm670_vm3, %v2083_v28  ;;  %1475 = vmatpush3.bf16.xpose.msra.mxu1 %v2086_v30  ;;  %v2195_v53 = vsel %vm670_vm3, %v2075_v46, 0  ;;  %v908_v50 = vrot.slane %v1927_v21, 1  ;;  %v909_v34 = vrot.slane %v1909_v60, 1  ;;  %v2210_v46 = vsel %vm670_vm3, %v2090_v29, 0 }
  0x54   : > { %1628 = vmatprep.subr.msk.bf16.mxu1 %vm670_vm3, %v1807_v41  ;;  %v2198_v55 = vsel %vm871_vm5, %v905_v45, %v906_v40  ;;  %v911_v32 = vrot.slane %v1969_v18, 1  ;;  %v912_v60 = vrot.slane %v1959_v10, 1  ;;  %v2225_v29 = vsel %vm670_vm3, %v2103_v59, 0 }
  0x55   : > { %v2213_v17 = vsel %vm871_vm5, %v908_v50, %v909_v34  ;;  %v914_v44 = vrot.slane %v2001_v14, 1  ;;  %v915_v10 = vrot.slane %v1997_v9, 1  ;;  %v2240_v59 = vsel %vm670_vm3, %v2109_v22, 0  ;;  %v1434_v34 = vld [vmem:[%s2441_s1 + $0x1c] sm:$0xf] }
  0x56   : > { %v2228_v56 = vsel %vm871_vm5, %v911_v32, %v912_v60  ;;  %v918_v9 = vrot.slane %v2031_v62, 1  ;;  %v2255_v22 = vsel %vm670_vm3, %v2114_v31, 0  ;;  %v2262_v7 = vsel %vm670_vm3, %v1794_v33, 0  ;;  %v1430_v31 = vld [vmem:[%s2441_s1 + $0x14] sm:$0xf] }
  0x57   : > { %v2272_v62 = vsel %vm670_vm3, %v2125_v4, 0  ;;  %v1428_v33 = vld [vmem:[%s2441_s1 + $0x10] sm:$0xf]  ;;  %v2460_v4 = vld [vmem:[#allocation5_spill] sm:$0xff]  ;;  %v2333_v40 = vsel %vm670_vm3, %v2121_v38, 0 }
  0x5a   : > { %1457 = vmatpush3.bf16.xpose.msra.mxu0 %v2118_v19  ;;  %1477 = vmatmul.mubr.msk.bf16.vlgmr.msra.gmra.mrb[0].mxu1 %vm670_vm3, %v1751_v2  ;;  %v2152_v2 = vsel %vm1739_vm2, 0, %v402_v6  ;;  %v2243_v6 = vsel %vm871_vm5, %v914_v44, %v915_v10 }
  0x5b   : > { %1620 = vmatprep.subr.msk.bf16.mxu0 %vm670_vm3, %v2121_v38  ;;  %1497 = vmatpush3.bf16.xpose.msra.mxu1 %v1844_v8  ;;  %v1131_v8 = vrot.slane %v2152_v2, 1 }
  0x5c   : > { %1629 = vmatprep.subr.msk.bf16.mxu1 %vm670_vm3, %v1833_v61  ;;  %1512 = vmatprep.mubr.msk.bf16.mxu1 %vm670_vm3, %v2130_v24 }
  0x5d   : > { %v2165_v35 = vsel %vm871_vm5, %v1131_v8, %v1132_v58  ;;  %v917_v58 = vrot.slane %v2041_v23, 1  ;;  %v1069_v8 = vshll.u32 %v2152_v2, 16 }
  0x5f   : > { %v2258_v52 = vsel %vm871_vm5, %v917_v58, %v918_v9 }
  0x61   : > { %1459 = vmatmul.mubr.msk.bf16.vlgmr.msra.gmra.mrb[0].mxu0 %vm670_vm3, %v1746_v1  ;;  %v2184_v1 = vsel %vm871_vm5, %v902_v36, %v903_v26  ;;  %v1074_v36 = vshll.u32 %v2137_v11, 16  ;;  %v2462_v11 = vld [vmem:[#allocation3_spill] sm:$0xff] }
  0x62   : > { %1479 = vmatpush3.bf16.xpose.msra.mxu0 %v926_v51  ;;  %1494 = vmatprep.mubr.msk.bf16.mxu0 %vm670_vm3, %v2162_v54  ;;  %v1067_v51 = vshrl.u32 %v2152_v2, 16  ;;  %v699_v50 = vsel %vm670_vm3, %v2462_v11, 0 }
  0x63   : > { %1621 = vmatprep.subr.msk.bf16.mxu0 %vm670_vm3, %v2168_v0  ;;  %1499 = vmatpush3.bf16.xpose.msra.mxu1 %v1885_v47 }
  0x64   : > { %1630 = vmatprep.subr.msk.bf16.mxu1 %vm670_vm3, %v1889_v48 }
  0x6a   : > { %1481 = vmatpush3.bf16.xpose.msra.mxu0 %v929_v39 }
  0x6b   : > { %1622 = vmatprep.subr.msk.bf16.mxu0 %vm670_vm3, %v2184_v1  ;;  %1501 = vmatpush3.bf16.xpose.msra.mxu1 %v1917_v12 }
  0x6c   : > { %1631 = vmatprep.subr.msk.bf16.mxu1 %vm670_vm3, %v1927_v21 }
  0x72   : > { %1483 = vmatpush3.bf16.xpose.msra.mxu0 %v2195_v53 }
  0x73   : > { %1623 = vmatprep.subr.msk.bf16.mxu0 %vm670_vm3, %v2198_v55  ;;  %1503 = vmatpush3.bf16.xpose.msra.mxu1 %v1964_v15 }
  0x74   : > { %1632 = vmatprep.subr.msk.bf16.mxu1 %vm670_vm3, %v1969_v18 }
  0x7a   : > { %1485 = vmatpush3.bf16.xpose.msra.mxu0 %v2210_v46 }
  0x7b   : > { %1624 = vmatprep.subr.msk.bf16.mxu0 %vm670_vm3, %v2213_v17  ;;  %1505 = vmatpush3.bf16.xpose.msra.mxu1 %v2019_v63 }
  0x7c   : > { %1633 = vmatprep.subr.msk.bf16.mxu1 %vm670_vm3, %v2001_v14 }
  0x82   : > { %1487 = vmatpush3.bf16.xpose.msra.mxu0 %v2225_v29 }
  0x83   : > { %1625 = vmatprep.subr.msk.bf16.mxu0 %vm670_vm3, %v2228_v56  ;;  %1507 = vmatpush3.bf16.xpose.msra.mxu1 %v2053_v16 }
  0x84   : > { %1634 = vmatprep.subr.msk.bf16.mxu1 %vm670_vm3, %v2041_v23 }
  0x8a   : > { %1489 = vmatpush3.bf16.xpose.msra.mxu0 %v2240_v59 }
  0x8b   : > { %1626 = vmatprep.subr.msk.bf16.mxu0 %vm670_vm3, %v2243_v6  ;;  %1509 = vmatpush3.bf16.xpose.msra.mxu1 %v2086_v30 }
  0x8c   : > { %1635 = vmatprep.subr.msk.bf16.mxu1 %vm670_vm3, %v2152_v2 }
  0x92   : > { %1491 = vmatpush3.bf16.xpose.msra.mxu0 %v2255_v22 }
  0x93   : > { %1627 = vmatprep.subr.msk.bf16.mxu0 %vm670_vm3, %v2258_v52  ;;  %1511 = vmatpush3.bf16.xpose.msra.mxu1 %v2262_v7 }
  0x94   : > { %1644 = vmatprep.subr.msk.bf16.mxu1 %vm670_vm3, %v2168_v0 }
  0x9a   : > { %1493 = vmatpush3.bf16.xpose.msra.mxu0 %v2272_v62  ;;  %1513 = vmatmul.mubr.msk.bf16.vlgmr.msra.gmra.mrb[4].mxu1 %vm670_vm3, %v2130_v24  ;;  %v2461_v24 = vld [vmem:[#allocation6_spill] sm:$0xff] }
  0x9b   : > { %1636 = vmatprep.subr.msk.bf16.mxu0 %vm670_vm3, %v1851_v13  ;;  %1533 = vmatpush3.bf16.xpose.msra.mxu1 %v929_v39  ;;  %v1076_v39 = vrot.slane %v1074_v36, 1 }
  0x9c   : > { %1645 = vmatprep.subr.msk.bf16.mxu1 %vm670_vm3, %v2184_v1  ;;  %1548 = vmatprep.mubr.msk.bf16.mxu1 %vm670_vm3, %v1430_v31 }
  0xa1   : > { %1495 = vmatmul.mubr.msk.bf16.vlgmr.msra.gmra.mrb[4].mxu0 %vm670_vm3, %v2162_v54  ;;  %v1071_v54 = vrot.slane %v1069_v8, 1 }
  0xa2   : > { %1515 = vmatpush3.bf16.xpose.msra.mxu0 %v1861_v27  ;;  %1530 = vmatprep.mubr.msk.bf16.mxu0 %vm670_vm3, %v1428_v33  ;;  %v2459_v27 = vld [vmem:[#allocation4_spill] sm:$0xff] }
  0xa3   : > { %1637 = vmatprep.subr.msk.bf16.mxu0 %vm670_vm3, %v1873_v37  ;;  %1535 = vmatpush3.bf16.xpose.msra.mxu1 %v2195_v53  ;;  %v1072_v26 = vor.u32 %v1071_v54, %v1067_v51 }
  0xa4   : > { %1646 = vmatprep.subr.msk.bf16.mxu1 %vm670_vm3, %v2198_v55 }
  0xa5   : > { %v1077_v45 = vsel %vm475_vm4, %v1072_v26, %v1076_v39 }
  0xaa   : > { %1517 = vmatpush3.bf16.xpose.msra.mxu0 %v1923_v20 }
  0xab   : > { %1638 = vmatprep.subr.msk.bf16.mxu0 %vm670_vm3, %v1931_v25  ;;  %1537 = vmatpush3.bf16.xpose.msra.mxu1 %v2210_v46 }
  0xac   : > { %1647 = vmatprep.subr.msk.bf16.mxu1 %vm670_vm3, %v2213_v17 }
  0xb2   : > { %1519 = vmatpush3.bf16.xpose.msra.mxu0 %v1951_v57 }
  0xb3   : > { %1639 = vmatprep.subr.msk.bf16.mxu0 %vm670_vm3, %v2459_v27  ;;  %1539 = vmatpush3.bf16.xpose.msra.mxu1 %v2225_v29 }
  0xb4   : > { %1648 = vmatprep.subr.msk.bf16.mxu1 %vm670_vm3, %v2228_v56 }
  0xba   : > { %1521 = vmatpush3.bf16.xpose.msra.mxu0 %v2460_v4 }
  0xbb   : > { %1640 = vmatprep.subr.msk.bf16.mxu0 %vm670_vm3, %v2461_v24  ;;  %1541 = vmatpush3.bf16.xpose.msra.mxu1 %v2240_v59 }
  0xbc   : > { %1649 = vmatprep.subr.msk.bf16.mxu1 %vm670_vm3, %v2243_v6 }
  0xc2   : > { %1523 = vmatpush3.bf16.xpose.msra.mxu0 %v2044_v3 }
  0xc3   : > { %1641 = vmatprep.subr.msk.bf16.mxu0 %vm670_vm3, %v2049_v49  ;;  %1543 = vmatpush3.bf16.xpose.msra.mxu1 %v2255_v22 }
  0xc4   : > { %1650 = vmatprep.subr.msk.bf16.mxu1 %vm670_vm3, %v2258_v52 }
  0xca   : > { %1525 = vmatpush3.bf16.xpose.msra.mxu0 %v2079_v43 }
  0xcb   : > { %1642 = vmatprep.subr.msk.bf16.mxu0 %vm670_vm3, %v2083_v28  ;;  %1545 = vmatpush3.bf16.xpose.msra.mxu1 %v2272_v62 }
  0xcc   : > { %1651 = vmatprep.subr.msk.bf16.mxu1 %vm670_vm3, %v2165_v35 }
  0xd2   : > { %1527 = vmatpush3.bf16.xpose.msra.mxu0 %v2118_v19 }
  0xd3   : > { %1643 = vmatprep.subr.msk.bf16.mxu0 %vm670_vm3, %v1077_v45  ;;  %1547 = vmatpush3.bf16.xpose.msra.mxu1 %v2333_v40 }
  0xd4   : > { %1660 = vmatprep.subr.msk.bf16.mxu1 %vm670_vm3, %v1873_v37  ;;  %v1432_v37 = vld [vmem:[%s2441_s1 + $0x18] sm:$0xf] }
  0xda   : > { %1529 = vmatpush3.bf16.xpose.msra.mxu0 %v699_v50  ;;  %1549 = vmatmul.mubr.msk.bf16.vlgmr.msra.gmra.mrb[8].mxu1 %vm670_vm3, %v1430_v31 }
  0xdb   : > { %1652 = vmatprep.subr.msk.bf16.mxu0 %vm670_vm3, %v1833_v61  ;;  %1569 = vmatpush3.bf16.xpose.msra.mxu1 %v1923_v20  ;;  %v2463_v61 = vld [vmem:[#allocation2_spill] sm:$0xff] }
  0xdc   : > { %1661 = vmatprep.subr.msk.bf16.mxu1 %vm670_vm3, %v1931_v25  ;;  %1584 = vmatprep.mubr.msk.bf16.mxu1 %vm670_vm3, %v1434_v34 }
  0xe1   : > { %1531 = vmatmul.mubr.msk.bf16.vlgmr.msra.gmra.mrb[8].mxu0 %vm670_vm3, %v1428_v33 }
  0xe2   : > { %1551 = vmatpush3.bf16.xpose.msra.mxu0 %v1885_v47  ;;  %1566 = vmatprep.mubr.msk.bf16.mxu0 %vm670_vm3, %v1432_v37  ;;  %v1436_v47 = vld [vmem:[%s2441_s1 + $0x20] sm:$0xf] }
  0xe3   : > { %1653 = vmatprep.subr.msk.bf16.mxu0 %vm670_vm3, %v1889_v48  ;;  %1571 = vmatpush3.bf16.xpose.msra.mxu1 %v1951_v57 }
  0xe4   : > { %1662 = vmatprep.subr.msk.bf16.mxu1 %vm670_vm3, %v2459_v27 }
  0xea   : > { %1553 = vmatpush3.bf16.xpose.msra.mxu0 %v1917_v12 }
  0xeb   : > { %1654 = vmatprep.subr.msk.bf16.mxu0 %vm670_vm3, %v1927_v21  ;;  %1573 = vmatpush3.bf16.xpose.msra.mxu1 %v2460_v4 }
  0xec   : > { %1663 = vmatprep.subr.msk.bf16.mxu1 %vm670_vm3, %v2461_v24 }
  0xf2   : > { %1555 = vmatpush3.bf16.xpose.msra.mxu0 %v1964_v15  ;;  %v1329_v15 = vld [vmem:[%s2442_s2] sm:$0xff] }
  0xf3   : > { %1655 = vmatprep.subr.msk.bf16.mxu0 %vm670_vm3, %v1969_v18  ;;  %1575 = vmatpush3.bf16.xpose.msra.mxu1 %v2044_v3  ;;  %v702_v3 = vsel %vm670_vm3, %v1851_v13, 0 }
  0xf4   : > { %1664 = vmatprep.subr.msk.bf16.mxu1 %vm670_vm3, %v2049_v49  ;;  %1332 = vperm.xlu0 %1685, %v1329_v15  }
  0xfa   : > { %1557 = vmatpush3.bf16.xpose.msra.mxu0 %v2019_v63 }
  0xfb   : > { %1656 = vmatprep.subr.msk.bf16.mxu0 %vm670_vm3, %v2001_v14  ;;  %1577 = vmatpush3.bf16.xpose.msra.mxu1 %v2079_v43  ;;  %v953_v14 = vsel %vm670_vm3, %v2168_v0, 0 }
  0xfc   : > { %1665 = vmatprep.subr.msk.bf16.mxu1 %vm670_vm3, %v2083_v28 }
 0x102   : > { %1559 = vmatpush3.bf16.xpose.msra.mxu0 %v2053_v16 }
 0x103   : > { %1657 = vmatprep.subr.msk.bf16.mxu0 %vm670_vm3, %v2041_v23  ;;  %1579 = vmatpush3.bf16.xpose.msra.mxu1 %v2118_v19  ;;  %v784_v23 = vsel %vm670_vm3, %v1807_v41, 0 }
 0x104   : > { %1666 = vmatprep.subr.msk.bf16.mxu1 %vm670_vm3, %v1077_v45 }
 0x10a   : > { %1561 = vmatpush3.bf16.xpose.msra.mxu0 %v2086_v30 }
 0x10b   : > { %1658 = vmatprep.subr.msk.bf16.mxu0 %vm670_vm3, %v2152_v2  ;;  %1581 = vmatpush3.bf16.xpose.msra.mxu1 %v699_v50 }
 0x10c   : > { %1667 = vmatprep.subr.msk.bf16.mxu1 %vm670_vm3, %v2463_v61 }
 0x112   : > { %1563 = vmatpush3.bf16.xpose.msra.mxu0 %v2262_v7 }
 0x113   : > { %1659 = vmatprep.subr.msk.bf16.mxu0 %vm670_vm3, %v1762_v5  ;;  %1583 = vmatpush3.bf16.xpose.msra.mxu1 %v702_v3 }
 0x11a   : > { %1565 = vmatpush3.bf16.xpose.msra.mxu0 %v784_v23  ;;  %1585 = vmatmul.mubr.msk.bf16.vlgmr.msra.gmra.mrb[12].mxu1 %vm670_vm3, %v1434_v34 }
 0x11b   : > { %1668 = vmatprep.subr.msk.bf16.mxu0 %vm670_vm3, %v2184_v1 }
 0x121   : > { %1567 = vmatmul.mubr.msk.bf16.vlgmr.msra.gmra.mrb[12].mxu0 %vm670_vm3, %v1432_v37 }
 0x122   : > { %1587 = vmatpush3.bf16.xpose.msra.mxu0 %v2195_v53  ;;  %1602 = vmatprep.mubr.msk.bf16.mxu0 %vm670_vm3, %v1436_v47 }
 0x123   : > { %1669 = vmatprep.subr.msk.bf16.mxu0 %vm670_vm3, %v2198_v55 }
 0x12a   : > { %1589 = vmatpush3.bf16.xpose.msra.mxu0 %v2210_v46 }
 0x12b   : > { %1670 = vmatprep.subr.msk.bf16.mxu0 %vm670_vm3, %v2213_v17 }
 0x12d   : > { %v832_v5 = vpop.f32.mrb[0].mxu1 }
 0x12e   : > { %v834_v41 = vpop.f32.mrb[1].mxu1 }
 0x12f   : > { %v836_v13 = vpop.f32.mrb[2].mxu1 }
 0x130   : > { %v837_v48 = vpop.f32.mrb[3].mxu1 }
 0x132   : > { %1591 = vmatpush3.bf16.xpose.msra.mxu0 %v2225_v29 }
 0x133   : > { %1671 = vmatprep.subr.msk.bf16.mxu0 %vm670_vm3, %v2228_v56 }
 0x134   : > { %v756_v12 = vpop.f32.mrb[0].mxu0 }
 0x135   : > { %v833_v20 = vadd.f32 %v832_v5, %v756_v12  ;;  %v758_v21 = vpop.f32.mrb[1].mxu0 }
 0x136   : > { %v835_v25 = vadd.f32 %v834_v41, %v758_v21  ;;  %v760_v57 = vpop.f32.mrb[2].mxu0 }
 0x137   : > { %v761_v18 = vpop.f32.mrb[3].mxu0 }
 0x13a   : > { %1593 = vmatpush3.bf16.xpose.msra.mxu0 %v2240_v59 }
 0x13b   : > { %1672 = vmatprep.subr.msk.bf16.mxu0 %vm670_vm3, %v2243_v6 }
 0x142   : > { %1595 = vmatpush3.bf16.xpose.msra.mxu0 %v2255_v22 }
 0x143   : > { %1673 = vmatprep.subr.msk.bf16.mxu0 %vm670_vm3, %v2258_v52 }
 0x14a   : > { %1597 = vmatpush3.bf16.xpose.msra.mxu0 %v2272_v62 }
 0x14b   : > { %1674 = vmatprep.subr.msk.bf16.mxu0 %vm670_vm3, %v2165_v35 }
 0x152   : > { %1599 = vmatpush3.bf16.xpose.msra.mxu0 %v2333_v40 }
 0x153   : > { %1675 = vmatprep.subr.msk.bf16.mxu0 %vm670_vm3, %v2144_v42 }
 0x15a   : > { %1601 = vmatpush3.bf16.xpose.msra.mxu0 %v953_v14 }
 0x161   : > { %1603 = vmatmul.mubr.msk.bf16.vlgmr.msra.gmra.mrb[16].mxu0 %vm670_vm3, %v1436_v47 }
 0x16d   : > { %v1058_v63 = vpop.f32.mrb[4].mxu1 }
 0x16e   : > { %v1060_v49 = vpop.f32.mrb[5].mxu1 }
 0x16f   : > { %v1062_v16 = vpop.f32.mrb[6].mxu1 }
 0x170   : > { %v1063_v43 = vpop.f32.mrb[7].mxu1 }
 0x173   : > { %v1333_v51 = vpop.permute.xlu0 %1332 }
 0x174   : > { %v1007_v28 = vpop.f32.mrb[4].mxu0 }
 0x175   : > { %v1014_v30 = vadd.f32 %v1007_v28, %v833_v20  ;;  %v1009_v19 = vpop.f32.mrb[5].mxu0 }
 0x176   : > { %v1015_v38 = vadd.f32 %v1009_v19, %v835_v25  ;;  %v1011_v2 = vpop.f32.mrb[6].mxu0 }
 0x177   : > { %v1065_v35 = vadd.f32 %v1058_v63, %v1014_v30  ;;  %v1012_v1 = vpop.f32.mrb[7].mxu0 }
 0x178   : > { %v1066_v53 = vadd.f32 %v1060_v49, %v1015_v38 }
 0x1ad   : > { %v1176_v55 = vpop.f32.mrb[8].mxu1 }
 0x1ae   : > { %v1178_v42 = vpop.f32.mrb[9].mxu1 }
 0x1af   : > { %v1180_v46 = vpop.f32.mrb[10].mxu1 }
 0x1b0   : > { %v1181_v17 = vpop.f32.mrb[11].mxu1 }
 0x1b4   : > { %v1120_v0 = vpop.f32.mrb[8].mxu0 }
 0x1b5   : > { %v1127_v32 = vadd.f32 %v1120_v0, %v1065_v35  ;;  %v1122_v60 = vpop.f32.mrb[9].mxu0 }
 0x1b6   : > { %v1128_v29 = vadd.f32 %v1122_v60, %v1066_v53  ;;  %v1124_v56 = vpop.f32.mrb[10].mxu0 }
 0x1b7   : > { %v1183_v44 = vadd.f32 %v1176_v55, %v1127_v32  ;;  %v1125_v10 = vpop.f32.mrb[11].mxu0 }
 0x1b8   : > { %v1184_v59 = vadd.f32 %v1178_v42, %v1128_v29 }
 0x1ed   : > { %v1272_v6 = vpop.f32.mrb[12].mxu1 }
 0x1ee   : > { %v1274_v58 = vpop.f32.mrb[13].mxu1 }
 0x1ef   : > { %v1276_v9 = vpop.f32.mrb[14].mxu1 }
 0x1f0   : > { %v1277_v22 = vpop.f32.mrb[15].mxu1 }
 0x1f4   : > { %v1224_v52 = vpop.f32.mrb[12].mxu0 }
 0x1f5   : > { %v1231_v7 = vadd.f32 %v1224_v52, %v1183_v44  ;;  %v1226_v62 = vpop.f32.mrb[13].mxu0 }
 0x1f6   : > { %v1232_v31 = vadd.f32 %v1226_v62, %v1184_v59  ;;  %v1228_v33 = vpop.f32.mrb[14].mxu0 }
 0x1f7   : > { %v1279_v27 = vadd.f32 %v1272_v6, %v1231_v7  ;;  %v1229_v4 = vpop.f32.mrb[15].mxu0 }
 0x1f8   : > { %v1280_v24 = vadd.f32 %v1274_v58, %v1232_v31 }
 0x234   : > { %v1320_v8 = vpop.f32.mrb[16].mxu0 }
 0x235   : > { %v1327_v54 = vadd.f32 %v1320_v8, %v1279_v27  ;;  %v1322_v36 = vpop.f32.mrb[17].mxu0 }
 0x236   : > { %v1328_v26 = vadd.f32 %v1322_v36, %v1280_v24  ;;  %v1324_v39 = vpop.f32.mrb[18].mxu0 }
 0x237   : > { %v1335_v45 = vadd.f32 %v1333_v51, %v1327_v54  ;;  %v1325_v40 = vpop.f32.mrb[19].mxu0 }
 0x238   : > { %v1336_v11 = vadd.f32 %v1333_v51, %v1328_v26 }
 0x239   : > { %v1337_v50 = vmax.f32 %v1335_v45, 0.0 }
 0x23a   : > { %v1338_v34 = vmax.f32 %v1336_v11, 0.0 }
 0x23b   : > { %1339 = vst [vmem:[%s170_s16] sm:$0xff] %v1337_v50 }
 0x23c   : > { %1340 = vst [vmem:[%s170_s16 + $0x8] sm:$0xff] %v1338_v34 }
 0x23d PF: > { %s13_s12 = sadd.s32 1, %s1708_s12  }
 0x23e   : > { %p10_p4 = scmp.ge.s32.totalorder %s13_s12, 4  }
 0x240   :  { %12 = sbr.rel (!%p10_p4) target bundleno = 1 (0x1), region = 70 }

// kernel: decoder_block_forward.2
= control target key start
LH: loop header
LB: loop body
LE: loop exit
PB: predicated region body
PF: predicated region fallthrough
CT: control target
= control target key end

     0   :  { %s3703_s0 = inlined_call_operand.vmem [shape: bf16[2,8,8,8], index: 0, kind: input, shape index: {}]   ;;  %s3704_s1 = inlined_call_operand.vmem [shape: f32[2,8,2,8,16], index: 1, kind: input, shape index: {}]   ;;  %s3705_s2 = inlined_call_operand.vmem [shape: bf16[2,8,8,8], index: 2, kind: input, shape index: {}]   ;;  %s3706_s3 = inlined_call_operand.vmem [shape: f32[1,8], index: 3, kind: input, shape index: {}]   ;;  %s3707_s4 = inlined_call_operand.vmem [shape: bf16[8,8], index: 4, kind: input, shape index: {}]   ;;  %s3708_s5 = inlined_call_operand.vmem [shape: f32[1,8], index: 5, kind: input, shape index: {}]   ;;  %s3709_s6 = inlined_call_operand.vmem [shape: bf16[8,8], index: 6, kind: input, shape index: {}]   ;;  %s3710_s7 = inlined_call_operand.vmem [shape: f32[1,8], index: 7, kind: input, shape index: {}]   ;;  %s3711_s8 = inlined_call_operand.vmem [shape: f32[1,8], index: 8, kind: input, shape index: {}]   ;;  %s3712_s9 = inlined_call_operand.<no memory space> [shape: f32[1,1], index: 9, kind: input, shape index: {}]   ;;  %s3713_s10 = inlined_call_operand.vmem [shape: bf16[2,8,2,8,32], index: 10, kind: output, shape index: {}]  }
   0x1   :  { %v15_v0 = vstv %s3712_s9 }
   0x2   :  { %16 = vst [vmem:[#allocation2] sm:$0x1] %v15_v0 }
   0x3   :  { %s3048_s15 = smov 0   ;;  %s3050_s16 = smov 0  }
   0x4   :  { %s3052_s17 = smov 0   ;;  %s3054_s18 = smov 0  }
   0x5   :  { %s3056_s19 = smov 0   ;;  %s3058_s20 = smov 0  }
   0x6   :  { %s3060_s21 = smov 0  }
   0x7 LB: > { %s31_s9 = sadd.s32 1, %s2976_s19  ;;  %s34_s22 = sadd.s32 1, %s2980_s20  ;;  %s2984_s21 = sphi %s3060_s21, %s22_s21   ;;  %s2980_s20 = sphi %s3058_s20, %s3725_s20   ;;  %s2976_s19 = sphi %s3056_s19, %s3724_s19   ;;  %s2972_s18 = sphi %s3054_s18, %s3723_s18   ;;  %s2968_s17 = sphi %s3052_s17, %s3722_s17   ;;  %s2964_s16 = sphi %s3050_s16, %s3721_s16   ;;  %s2960_s15 = sphi %s3048_s15, %s3720_s15  }
   0x8   : > { %p32_p0 = scmp.ge.s32.totalorder %s31_s9, 2  ;;  %s2303_s23 = sadd.s32 4294967295, %s2984_s21  }
   0x9   : > { %p76_p1 = scmp.ne.s32.totalorder %s2964_s16, %s2960_s15  ;;  %p77_p2 = scmp.eq.s32.totalorder %s2984_s21, 0 }
   0xa   : > { %s3727_s9 = smov (%p32_p0, %s31_s9), 0  ;;  %s3729_s22 = smov (!%p32_p0, %s34_s22), %s2980_s20 }
   0xb   : > { %3715 = sst [smem:[#allocation5_spill]] %s3727_s9  ;;  %p36_p3 = scmp.ge.s32.totalorder %s3729_s22, 2 }
   0xc   : > { %p281_p4 = scmp.eq.s32.totalorder %s2303_s23, 3  ;;  %s65_s24 = ssub.s32 %s2976_s19, %s3727_s9 }
   0xd   : > { %p78_p5 = por %p77_p2, %p76_p1  ;;  %s3731_s22 = smov (%p36_p3, %s3729_s22), 0 }
   0xe   : > { %p3096_p6 = por %p281_p4, %p76_p1  ;;  %s64_s26 = ssub.s32 %s2980_s20, %s3731_s22 }
   0xf   : > { %s66_s27 = sor.u32 %s65_s24, %s64_s26  ;;  %s69_s28 = sadd.s32 1, %s2964_s16 }
  0x10   : > { %p67_p7 = scmp.eq.s32.totalorder %s66_s27, 0  ;;  %p2306_p8 = scmp.ge.s32.totalorder %s2984_s21, 4 }
  0x12   : > { %s3104_s29 = scalar_select %p67_p7, %s2964_s16, %s69_s28  }
  0x13   : > { %324 = sbr.rel (%p2306_p8) target bundleno = 36 (0x24), region = 44 }
  0x1a   : > { %335 = sbr.rel (!%p78_p5) target bundleno = 36 (0x24), region = 52  ;;  %s337_s30 = sand.u32 (%p78_p5), 1, %s2964_s16  }
  0x1b   : > { %s2308_s11 = sshll.u32 (%p78_p5), %s2980_s20, 4  ;;  %s2307_s12 = sshll.u32 (%p78_p5), %s337_s30, 6 }
  0x1c   : > { %s341_s13 = sadd.s32 (%p78_p5), %s2976_s19, %s2308_s11  ;;  %s339_s26 = scalar_lea.vmem (%p78_p5), [#allocation3], %s2307_s12 }
  0x1d   : > { %s2309_s14 = sshll.u32 (%p78_p5), %s341_s13, 3 }
  0x1e   : > { %s343_s24 = scalar_lea.vmem (%p78_p5), %s3704_s1, %s2309_s14 }
  0x1f   : > { %v385_v1 = vld [vmem:[%s343_s24] sm:$0xff] (%p78_p5)  ;;  %v387_v2 = vld [vmem:[%s343_s24 + $0x10] sm:$0xff] (%p78_p5) }
  0x20   : > { %v389_v3 = vld [vmem:[%s343_s24 + $0x20] sm:$0xff] (%p78_p5)  ;;  %386 = vst [vmem:[%s339_s26] sm:$0xff] (%p78_p5), %v385_v1  ;;  %388 = vst [vmem:[%s339_s26 + $0x8] sm:$0xff] (%p78_p5), %v387_v2  ;;  %v391_v4 = vld [vmem:[%s343_s24 + $0x30] sm:$0xff] (%p78_p5) }
  0x21   : > { %390 = vst [vmem:[%s339_s26 + $0x10] sm:$0xff] %v389_v3  ;;  %v393_v5 = vld [vmem:[%s343_s24 + $0x40] sm:$0xff]  ;;  %v395_v6 = vld [vmem:[%s343_s24 + $0x50] sm:$0xff]  ;;  %392 = vst [vmem:[%s339_s26 + $0x18] sm:$0xff] %v391_v4 }
  0x22   : > { %394 = vst [vmem:[%s339_s26 + $0x20] sm:$0xff] %v393_v5  ;;  %396 = vst [vmem:[%s339_s26 + $0x28] sm:$0xff] %v395_v6  ;;  %v397_v7 = vld [vmem:[%s343_s24 + $0x60] sm:$0xff]  ;;  %v399_v8 = vld [vmem:[%s343_s24 + $0x70] sm:$0xff] }
  0x23   : > { %398 = vst [vmem:[%s339_s26 + $0x30] sm:$0xff] %v397_v7  ;;  %400 = vst [vmem:[%s339_s26 + $0x38] sm:$0xff] %v399_v8 }
  0x24 PF: > { %p2310_p9 = scmp.ge.s32.totalorder %s2984_s21, 1  ;;  %p413_p10 = scmp.lt.s32.totalorder %s2984_s21, 5 }
  0x26   : > { %p414_p11 = pnand %p2310_p9, %p413_p10 }
  0x27   : > { %p471_p12 = scmp.lt.s32.totalorder (!%p414_p11), %s2968_s17, 1  ;;  %p466_p13 = scmp.lt.s32.totalorder (!%p414_p11), %s2972_s18, 1  ;;  %v2986_v9 = vmov (!%p414_p11), 0   ;;  %vm573_vm0 = vcmask (!%p414_p11), 1043456   ;;  %vm610_vm1 = vcmask (!%p414_p11), 64512   ;;  %vm2094_vm4 = vcmask (!%p414_p11), 130048  }
  0x28   : > { %417 = sbr.rel (%p414_p11) target bundleno = 1341 (0x53d), region = 94  ;;  %2790 = vset.pattern.permute.xlu0 (!%p414_p11), %v2986_v9  ;;  %2789 = vset.pattern.permute.xlu1 (!%p414_p11), %v2986_v9  ;;  %vm574_vm2 = vsmask.f32 (!%p414_p11), 3328  ;;  %s420_s30 = sand.u32 (!%p414_p11), 1, %s2960_s15   ;;  %vm2103_vm5 = vcmask (!%p414_p11), 195584   ;;  %vm2120_vm6 = vcmask (!%p414_p11), 257024  }
  0x29   : > { %vm3177_vm3 = vmand (!%p414_p11), %vm573_vm0, %vm574_vm2  ;;  %s2311_s11 = sshll.u32 (!%p414_p11), %s420_s30, 6  ;;  %s2987_s14 = smov (!%p414_p11), 120  }
  0x2a   : > { %s2312_s23 = sshll.u32 (!%p414_p11), %s420_s30, 5 }
  0x2b   : > { %s3625_s15 = scalar_lea.vmem (!%p414_p11), [#allocation4], %s2312_s23 }
  0x2f   : > { %s472_s9 = scalar_select %p471_p12, %s2968_s17, 1 }
  0x30   : > { %s467_s27 = scalar_select %p466_p13, %s2972_s18, 1 }
  0x31   : > { %s2424_s28 = sshll.u32 %s472_s9, 5  ;;  %s2419_s30 = sshll.u32 (%p3096_p6), %s2972_s18, 4 }
  0x32   : > { %s3124_s12 = scalar_lea.vmem %s3705_s2, %s2424_s28  ;;  %s2423_s13 = sshll.u32 %s467_s27, 5 }
  0x33   : > { %v605_v10 = vld [vmem:[%s3124_s12] sm:$0xf]  ;;  %s3130_s24 = scalar_lea.vmem %s3703_s0, %s2423_s13  ;;  %v2335_v11 = vld [vmem:[%s3124_s12 + $0x4] sm:$0xf]  ;;  %v2344_v25 = vld [vmem:[%s3124_s12 + $0x8] sm:$0xf] }
  0x34   : > { %2717 = vmatprep.subr.msk.bf16.mxu0 %vm573_vm0, %v605_v10  ;;  %v625_v12 = vsel %vm573_vm0, %v605_v10, 0  ;;  %v477_v13 = vld [vmem:[%s3130_s24] sm:$0xf]  ;;  %v3137_v14 = vld [vmem:[%s3130_s24 + $0x4] sm:$0xf]  ;;  %v741_v23 = vsel %vm573_vm0, %v2335_v11, 0 }
  0x35   : > { %2486 = vmatpush3.bf16.msra.mxu0 %v625_v12  ;;  %v3140_v15 = vld [vmem:[%s3130_s24 + $0x8] sm:$0xf]  ;;  %v2317_v16 = vcombine.low %v477_v13, %v477_v13  ;;  %v2318_v17 = vcombine.low %v3137_v14, %v3137_v14  ;;  %v3145_v18 = vcombine.low %v477_v13, %v3137_v14  ;;  %v3148_v19 = vld [vmem:[%s3130_s24 + $0xc] sm:$0xf]  ;;  %v3161_v24 = vld [vmem:[%s3130_s24 + $0x10] sm:$0xf] }
  0x36   : > { %v2319_v20 = vcombine.low %v3140_v15, %v3140_v15  ;;  %v2320_v21 = vcombine.low %v3148_v19, %v3148_v19  ;;  %v3156_v22 = vcombine.low %v3140_v15, %v3148_v19  ;;  %2718 = vmatprep.subr.msk.bf16.mxu0 %vm573_vm0, %v2335_v11  ;;  %v3167_v30 = vld [vmem:[%s3130_s24 + $0x14] sm:$0xf]  ;;  %v2321_v37 = vcombine.low %v3161_v24, %v3161_v24  ;;  %v483_v38 = vld [vmem:[%s3130_s24 + $0x18] sm:$0xf]  ;;  %v484_v39 = vld [vmem:[%s3130_s24 + $0x1c] sm:$0xf]  ;;  %s2137_s24 = sadd.s32 (%p3096_p6), %s2968_s17, %s2419_s30 }
  0x37   : > { %v510_v26 = vshrl.u32 %v2317_v16, 16  ;;  %v512_v27 = vshll.u32 %v2317_v16, 16  ;;  %v517_v28 = vshrl.u32 %v2318_v17, 16  ;;  %v519_v29 = vshll.u32 %v2318_v17, 16  ;;  %2487 = vmatprep.mubr.msk.bf16.mxu0 %vm610_vm1, %v3145_v18  ;;  %v2353_v17 = vld [vmem:[%s3124_s12 + $0xc] sm:$0xf] }
  0x38   : > { %v524_v31 = vshrl.u32 %v2319_v20, 16  ;;  %v526_v32 = vshll.u32 %v2319_v20, 16  ;;  %v531_v33 = vshrl.u32 %v2320_v21, 16  ;;  %v533_v34 = vshll.u32 %v2320_v21, 16  ;;  %2488 = vmatmul.mubr.msk.bf16.vlgmr.msra.gmra.mrb[0].mxu0 %vm610_vm1, %v3156_v22  ;;  %s422_s13 = scalar_lea.vmem [#allocation3], %s2311_s11 }
  0x39   : > { %v514_v35 = vrot.slane %v512_v27, 1  ;;  %v521_v36 = vrot.slane %v519_v29, 1  ;;  %2496 = vmatpush3.bf16.msra.mxu0 %v741_v23  ;;  %v3183_v43 = vcombine.low %v3161_v24, %v3167_v30  ;;  %v2322_v46 = vcombine.low %v3167_v30, %v3167_v30  ;;  %v3292_v41 = vld [vmem:[%s422_s13 + $0x28] sm:$0xff] }
  0x3a   : > { %v528_v40 = vrot.slane %v526_v32, 1  ;;  %v535_v42 = vrot.slane %v533_v34, 1  ;;  %2719 = vmatprep.subr.msk.bf16.mxu0 %vm573_vm0, %v2344_v25  ;;  %v2323_v47 = vcombine.low %v483_v38, %v483_v38  ;;  %v2324_v50 = vcombine.low %v484_v39, %v484_v39 }
  0x3b   : > { %v515_v44 = vor.u32 %v514_v35, %v510_v26  ;;  %v522_v45 = vor.u32 %v521_v36, %v517_v28  ;;  %2491 = vmatprep.mubr.msk.bf16.mxu0 %vm610_vm1, %v3183_v43  ;;  %v3190_v51 = vcombine.low %v483_v38, %v484_v39  ;;  %v538_v54 = vshrl.u32 %v2321_v37, 16  ;;  %v1006_v35 = vld [vmem:[%s3707_s4] sm:$0xf] }
  0x3c   : > { %v529_v48 = vor.u32 %v528_v40, %v524_v31  ;;  %v536_v49 = vor.u32 %v535_v42, %v531_v33  ;;  %v540_v55 = vshll.u32 %v2321_v37, 16  ;;  %v545_v58 = vshrl.u32 %v2322_v46, 16  ;;  %2721 = vmatprep.subr.msk.bf16.mxu1 %vm573_vm0, %v1006_v35  ;;  %v1098_v37 = vld [vmem:[%s3709_s6] sm:$0xf] }
  0x3d   : > { %v576_v52 = vsel %vm3177_vm3, %v515_v44, 0  ;;  %v577_v53 = vsel %vm3177_vm3, %v522_v45, 0  ;;  %v547_v59 = vshll.u32 %v2322_v46, 16  ;;  %v554_v62 = vshll.u32 %v2323_v47, 16  ;;  %v3290_v40 = vld [vmem:[%s422_s13 + $0x20] sm:$0xff]  ;;  %v3296_v44 = vld [vmem:[%s422_s13 + $0x10] sm:$0xff] }
  0x3e   : > { %v3196_v56 = vcombine.low %v576_v52, %v577_v53  ;;  %v542_v57 = vrot.slane %v540_v55, 1  ;;  %v578_v60 = vsel %vm3177_vm3, %v529_v48, 0  ;;  %v579_v61 = vsel %vm3177_vm3, %v536_v49, 0  ;;  %v3300_v46 = vld [vmem:[%s422_s13 + $0x18] sm:$0xff] }
  0x3f   : > { %v561_v63 = vshll.u32 %v2324_v50, 16  ;;  %v549_v1 = vrot.slane %v547_v59, 1  ;;  %v552_v2 = vshrl.u32 %v2323_v47, 16  ;;  %v559_v3 = vshrl.u32 %v2324_v50, 16  ;;  %v3302_v47 = vld [vmem:[%s422_s13 + $0x30] sm:$0xff]  ;;  %v3304_v48 = vld [vmem:[%s422_s13 + $0x38] sm:$0xff] }
  0x40   : > { %2492 = vmatmul.mubr.msk.bf16.gmra.mrb[4].mxu0 %vm610_vm1, %v3190_v51  ;;  %v543_v0 = vor.u32 %v542_v57, %v538_v54  ;;  %v556_v4 = vrot.slane %v554_v62, 1  ;;  %v3208_v8 = vcombine.low %v578_v60, %v579_v61  ;;  %v835_v13 = vsel %vm573_vm0, %v2344_v25, 0  ;;  %v3313_v52 = vld [vmem:[%s3706_s3] ss:$0 sm:$0xff] }
  0x41   : > { %2497 = vmatprep.mubr.msk.bf16.mxu0 %vm610_vm1, %v3196_v56  ;;  %v563_v5 = vrot.slane %v561_v63, 1  ;;  %v550_v6 = vor.u32 %v549_v1, %v545_v58  ;;  %v3229_v25 = vcombine.low %v3137_v14, %v3140_v15  ;;  %v3237_v26 = vcombine.low %v3148_v19, %v3161_v24 }
  0x42   : > { %v580_v7 = vsel %vm3177_vm3, %v543_v0, 0  ;;  %v557_v11 = vor.u32 %v556_v4, %v552_v2  ;;  %v3240_v27 = vcombine.low %v3167_v30, %v483_v38  ;;  %v931_v28 = vsel %vm573_vm0, %v2353_v17, 0  ;;  %v3286_v38 = vld [vmem:[%s422_s13] sm:$0xff]  ;;  %v2382_v4 = vld [vmem:[%s3124_s12 + $0x10] sm:$0xf] }
  0x43   : > { %v581_v10 = vsel %vm3177_vm3, %v550_v6, 0  ;;  %v564_v12 = vor.u32 %v563_v5, %v559_v3  ;;  %v2325_v14 = vcombine.low %v2986_v9, %v2986_v9  ;;  %v3250_v15 = vcombine.low %v484_v39, %v2986_v9  ;;  %v3288_v39 = vld [vmem:[%s422_s13 + $0x8] sm:$0xff]  ;;  %s2988_s13 = smov 8  }
  0x44   : > { %v3213_v16 = vcombine.low %v580_v7, %v581_v10  ;;  %v582_v20 = vsel %vm3177_vm3, %v557_v11, 0  ;;  %v3252_v19 = vcombine.low %v577_v53, %v578_v60  ;;  %v3258_v31 = vcombine.low %v579_v61, %v580_v7 }
  0x45   : > { %v583_v21 = vsel %vm3177_vm3, %v564_v12, 0  ;;  %v590_v24 = vshll.u32 %v2325_v14, 16  ;;  %v588_v29 = vshrl.u32 %v2325_v14, 16  ;;  %v3260_v32 = vcombine.low %v581_v10, %v582_v20 }
  0x46   : > { %v3225_v23 = vcombine.low %v582_v20, %v583_v21  ;;  %v1031_v36 = vsel %vm573_vm0, %v1006_v35, 0  ;;  %v1099_v42 = vpack.c.bf16 %v3288_v39, %v3286_v38  ;;  %v1101_v45 = vpack.c.bf16 %v3292_v41, %v3290_v40 }
  0x47   : > { %v592_v30 = vrot.slane %v590_v24, 1  ;;  %2526 = vmatpush3.bf16.msra.mxu1 %v1031_v36  ;;  %v1100_v49 = vpack.c.bf16 %v3300_v46, %v3296_v44  ;;  %v1102_v50 = vpack.c.bf16 %v3304_v48, %v3302_v47  ;;  %v3336_v2 = vsel %vm573_vm0, %v1098_v37, 0  ;;  %v2387_v24 = vld [vmem:[%s3124_s12 + $0x14] sm:$0xf] }
  0x48   : > { %2498 = vmatmul.mubr.msk.bf16.vlgmr.msra.gmra.mrb[0].mxu0 %vm610_vm1, %v3208_v8  ;;  %2722 = vmatprep.subr.msk.bf16.mxu1 %vm573_vm0, %v1098_v37  ;;  %v1359_v14 = vsel %vm573_vm0, %v2382_v4, 0 }
  0x49   : > { %2506 = vmatpush3.bf16.msra.mxu0 %v835_v13  ;;  %2501 = vmatprep.mubr.msk.bf16.mxu0 %vm610_vm1, %v3213_v16  ;;  %v593_v33 = vor.u32 %v592_v30, %v588_v29  ;;  %v1437_v29 = vsel %vm573_vm0, %v2387_v24, 0  ;;  %v2392_v30 = vld [vmem:[%s3124_s12 + $0x18] sm:$0xf] }
  0x4a   : > { %2720 = vmatprep.subr.msk.bf16.mxu0 %vm573_vm0, %v2353_v17  ;;  %1753 = vrot.lane.b32.xlu0 %v1099_v42, %s2987_s14 }
  0x4b   : > { %v595_v9 = vsel %vm3177_vm3, %v593_v33, 0  ;;  %1757 = vrot.lane.b32.xlu1 %v1101_v45, %s2987_s14  ;;  %v2397_v33 = vld [vmem:[%s3124_s12 + $0x1c] sm:$0xf]  ;;  %s2420_s12 = sshll.u32 (%p3096_p6), %s2137_s24, 2 }
  0x4c   : > { %v3268_v34 = vcombine.low %v583_v21, %v595_v9  ;;  %s2139_s9 = scalar_lea.vmem (%p3096_p6), %s3713_s10, %s2420_s12 }
  0x4e   : > { %1755 = vrot.lane.b32.xlu0 %v1100_v49, %s2987_s14 }
  0x4f   : > { %1759 = vrot.lane.b32.xlu1 %v1102_v50, %s2987_s14  ;;  %s2989_s14 = smov 24  }
  0x50   : > { %2502 = vmatmul.mubr.msk.bf16.gmra.mrb[4].mxu0 %vm610_vm1, %v3225_v23 }
  0x51   : > { %2507 = vmatprep.mubr.msk.bf16.mxu0 %vm610_vm1, %v3229_v25 }
  0x58   : > { %2508 = vmatmul.mubr.msk.bf16.vlgmr.msra.gmra.mrb[0].mxu0 %vm610_vm1, %v3237_v26 }
  0x59   : > { %2516 = vmatpush3.bf16.msra.mxu0 %v931_v28  ;;  %2511 = vmatprep.mubr.msk.bf16.mxu0 %vm610_vm1, %v3240_v27 }
  0x5a   : > { %2727 = vmatprep.subr.msk.bf16.mxu0 %vm573_vm0, %v1006_v35 }
  0x60   : > { %2512 = vmatmul.mubr.msk.bf16.gmra.mrb[4].mxu0 %vm610_vm1, %v3250_v15 }
  0x61   : > { %2517 = vmatprep.mubr.msk.bf16.mxu0 %vm610_vm1, %v3252_v19 }
  0x68   : > { %2518 = vmatmul.mubr.msk.bf16.vlgmr.msra.gmra.mrb[0].mxu0 %vm610_vm1, %v3258_v31 }
  0x69   : > { %2521 = vmatprep.mubr.msk.bf16.mxu0 %vm610_vm1, %v3260_v32  ;;  %2586 = vmatpush3.bf16.msra.mxu0 %v1031_v36 }
  0x6a   : > { %2728 = vmatprep.subr.msk.bf16.mxu0 %vm573_vm0, %v1098_v37 }
  0x70   : > { %2522 = vmatmul.mubr.msk.bf16.gmra.mrb[4].mxu0 %vm610_vm1, %v3268_v34 }
 0x13b   : > { %v2519_v53 = vpop.f32.mrb[0].mxu0 }
 0x13c   : > { %v967_v54 = vpop.f32.mrb[1].mxu0  ;;  %v3316_v57 = vadd.f32 %v2519_v53, %v3313_v52 }
 0x13d   : > { %v2520_v55 = vpop.f32.mrb[2].mxu0  ;;  %v3322_v60 = vadd.f32 %v3313_v52, %v967_v54 }
 0x13e   : > { %v3319_v58 = vadd.f32 %v2520_v55, %v3313_v52  ;;  %v970_v59 = vpop.f32.mrb[3].mxu0 }
 0x13f   : > { %v3325_v61 = vadd.f32 %v3313_v52, %v970_v59 }
 0x140   : > { %v2796_v62 = vpack.i.bf16 %v3319_v58, %v3316_v57  ;;  %v1008_v63 = vpack.c.bf16 %v3319_v58, %v3316_v57 }
 0x141   : > { %v2791_v0 = vpack.i.bf16 %v3325_v61, %v3322_v60  ;;  %v1007_v1 = vpack.c.bf16 %v3325_v61, %v3322_v60 }
 0x143   : > { %v2523_v3 = vpop.f32.mrb[4].mxu0  ;;  %2527 = vmatprep.mubr.msk.bf16.mxu1 %vm610_vm1, %v1007_v1 }
 0x144   : > { %v983_v5 = vpop.f32.mrb[5].mxu0  ;;  %2528 = vmatmul.mubr.msk.bf16.vlgmr.msra.gmra.mrb[0].mxu1 %vm610_vm1, %v1008_v63  ;;  %v3343_v7 = vadd.f32 %v2523_v3, %v3313_v52 }
 0x145   : > { %v2524_v6 = vpop.f32.mrb[6].mxu0  ;;  %2536 = vmatpush3.bf16.msra.mxu1 %v3336_v2  ;;  %v3350_v12 = vadd.f32 %v3313_v52, %v983_v5 }
 0x146   : > { %v3346_v10 = vadd.f32 %v2524_v6, %v3313_v52  ;;  %v986_v11 = vpop.f32.mrb[7].mxu0  ;;  %2723 = vmatprep.subr.msk.bf16.mxu1 %vm573_vm0, %v2382_v4  ;;  %v1754_v6 = vpop.permute.xlu0 %1753 }
 0x147   : > { %v3353_v13 = vadd.f32 %v3313_v52, %v986_v11  ;;  %v1758_v11 = vpop.permute.xlu1 %1757 }
 0x148   : > { %v2806_v17 = vpack.i.bf16 %v3346_v10, %v3343_v7  ;;  %v1010_v20 = vpack.c.bf16 %v3346_v10, %v3343_v7 }
 0x149   : > { %v2801_v21 = vpack.i.bf16 %v3353_v13, %v3350_v12  ;;  %v1009_v28 = vpack.c.bf16 %v3353_v13, %v3350_v12 }
 0x14b   : > { %2531 = vmatprep.mubr.msk.bf16.mxu1 %vm610_vm1, %v1009_v28  ;;  %v2362_v28 = vld [vmem:[%s3708_s5] ss:$0 sm:$0xff] }
 0x14c   : > { %2532 = vmatmul.mubr.msk.bf16.gmra.mrb[4].mxu1 %vm610_vm1, %v1010_v20  ;;  %v1760_v20 = vpop.permute.xlu1 %1759 }
 0x14d   : > { %2537 = vmatprep.mubr.msk.bf16.mxu1 %vm610_vm1, %v1099_v42 }
 0x154   : > { %2538 = vmatmul.mubr.msk.bf16.vlgmr.msra.gmra.mrb[0].mxu1 %vm610_vm1, %v1100_v49 }
 0x155   : > { %2546 = vmatpush3.bf16.msra.mxu1 %v1359_v14  ;;  %2541 = vmatprep.mubr.msk.bf16.mxu1 %vm610_vm1, %v1101_v45  ;;  %v2367_v14 = vld [vmem:[%s3710_s7] ss:$0 sm:$0xff] }
 0x156   : > { %2724 = vmatprep.subr.msk.bf16.mxu1 %vm573_vm0, %v2387_v24  ;;  %v3482_v24 = vadd.f32 %v2367_v14, %v2362_v28 }
 0x15c   : > { %2542 = vmatmul.mubr.msk.bf16.gmra.mrb[4].mxu1 %vm610_vm1, %v1102_v50 }
 0x15d   : > { %2547 = vmatprep.mubr.msk.bf16.mxu1 %vm610_vm1, %v3145_v18  ;;  %v1515_v18 = vsel %vm573_vm0, %v2392_v30, 0 }
 0x164   : > { %2548 = vmatmul.mubr.msk.bf16.vlgmr.msra.gmra.mrb[8].mxu1 %vm610_vm1, %v3156_v22  ;;  %v1593_v22 = vsel %vm573_vm0, %v2397_v33, 0 }
 0x165   : > { %2556 = vmatpush3.bf16.msra.mxu1 %v1437_v29  ;;  %2551 = vmatprep.mubr.msk.bf16.mxu1 %vm610_vm1, %v3183_v43 }
 0x166   : > { %2725 = vmatprep.subr.msk.bf16.mxu1 %vm573_vm0, %v2392_v30 }
 0x16c   : > { %2552 = vmatmul.mubr.msk.bf16.gmra.mrb[12].mxu1 %vm610_vm1, %v3190_v51 }
 0x16d   : > { %2557 = vmatprep.mubr.msk.bf16.mxu1 %vm610_vm1, %v3196_v56 }
 0x174   : > { %2558 = vmatmul.mubr.msk.bf16.vlgmr.msra.gmra.mrb[8].mxu1 %vm610_vm1, %v3208_v8 }
 0x175   : > { %2566 = vmatpush3.bf16.msra.mxu1 %v1515_v18  ;;  %2561 = vmatprep.mubr.msk.bf16.mxu1 %vm610_vm1, %v3213_v16 }
 0x176   : > { %2726 = vmatprep.subr.msk.bf16.mxu1 %vm573_vm0, %v2397_v33 }
 0x17c   : > { %2562 = vmatmul.mubr.msk.bf16.gmra.mrb[12].mxu1 %vm610_vm1, %v3225_v23 }
 0x17d   : > { %2567 = vmatprep.mubr.msk.bf16.mxu1 %vm610_vm1, %v3229_v25 }
 0x184   : > { %2568 = vmatmul.mubr.msk.bf16.vlgmr.msra.gmra.mrb[8].mxu1 %vm610_vm1, %v3237_v26 }
 0x185   : > { %2576 = vmatpush3.bf16.msra.mxu1 %v1593_v22  ;;  %2571 = vmatprep.mubr.msk.bf16.mxu1 %vm610_vm1, %v3240_v27 }
 0x18c   : > { %2572 = vmatmul.mubr.msk.bf16.gmra.mrb[12].mxu1 %vm610_vm1, %v3250_v15 }
 0x18d   : > { %2577 = vmatprep.mubr.msk.bf16.mxu1 %vm610_vm1, %v3252_v19 }
 0x194   : > { %2578 = vmatmul.mubr.msk.bf16.vlgmr.msra.gmra.mrb[8].mxu1 %vm610_vm1, %v3258_v31 }
 0x195   : > { %2581 = vmatprep.mubr.msk.bf16.mxu1 %vm610_vm1, %v3260_v32 }
 0x19c   : > { %2582 = vmatmul.mubr.msk.bf16.gmra.mrb[12].mxu1 %vm610_vm1, %v3268_v34 }
 0x227   : > { %v3411_v43 = vpop.f32.mrb[0].mxu1 }
 0x228   : > { %v3413_v51 = vpop.f32.mrb[1].mxu1 }
 0x229   : > { %v3415_v56 = vpop.f32.mrb[2].mxu1 }
 0x22a   : > { %v3417_v8 = vpop.f32.mrb[3].mxu1 }
 0x22f   : > { %v3419_v16 = vpop.f32.mrb[4].mxu1 }
 0x230   : > { %v3421_v23 = vpop.f32.mrb[5].mxu1 }
 0x231   : > { %v3423_v25 = vpop.f32.mrb[6].mxu1 }
 0x232   : > { %v3425_v26 = vpop.f32.mrb[7].mxu1 }
 0x267   : > { %v2579_v27 = vpop.f32.mrb[8].mxu1 }
 0x268   : > { %v1629_v15 = vpop.f32.mrb[9].mxu1  ;;  %v3428_v31 = vadd.f32 %v2579_v27, %v3313_v52 }
 0x269   : > { %v2580_v19 = vpop.f32.mrb[10].mxu1  ;;  %v3434_v34 = vadd.f32 %v3313_v52, %v1629_v15 }
 0x26a   : > { %v3431_v32 = vadd.f32 %v2580_v19, %v3313_v52  ;;  %v1632_v9 = vpop.f32.mrb[11].mxu1 }
 0x26b   : > { %v3437_v35 = vadd.f32 %v3313_v52, %v1632_v9 }
 0x26c   : > { %v2816_v36 = vpack.i.bf16 %v3431_v32, %v3428_v31  ;;  %v1669_v37 = vpack.c.bf16 %v3431_v32, %v3428_v31 }
 0x26d   : > { %v2811_v42 = vpack.i.bf16 %v3437_v35, %v3434_v34  ;;  %v1668_v45 = vpack.c.bf16 %v3437_v35, %v3434_v34 }
 0x26f   : > { %v2583_v49 = vpop.f32.mrb[12].mxu1  ;;  %2587 = vmatprep.mubr.msk.bf16.mxu0 %vm610_vm1, %v1668_v45  ;;  %v3491_v45 = vld [vmem:[%s3711_s8] ss:$0 sm:$0xff] }
 0x270   : > { %v1645_v50 = vpop.f32.mrb[13].mxu1  ;;  %2588 = vmatmul.mubr.msk.bf16.vlgmr.msra.gmra.mrb[8].mxu0 %vm610_vm1, %v1669_v37  ;;  %v3451_v54 = vadd.f32 %v2583_v49, %v3313_v52 }
 0x271   : > { %v2584_v53 = vpop.f32.mrb[14].mxu1  ;;  %2596 = vmatpush3.bf16.msra.mxu0 %v3336_v2  ;;  %v3457_v63 = vadd.f32 %v3313_v52, %v1645_v50 }
 0x272   : > { %v3454_v55 = vadd.f32 %v2584_v53, %v3313_v52  ;;  %v1648_v59 = vpop.f32.mrb[15].mxu1 }
 0x273   : > { %v3460_v1 = vadd.f32 %v3313_v52, %v1648_v59  ;;  %v1756_v52 = vpop.permute.xlu0 %1755 }
 0x274   : > { %v2846_v3 = vpack.i.bf16 %v3454_v55, %v3451_v54  ;;  %v1671_v4 = vpack.c.bf16 %v3454_v55, %v3451_v54 }
 0x275   : > { %v2841_v2 = vpack.i.bf16 %v3460_v1, %v3457_v63  ;;  %v1670_v5 = vpack.c.bf16 %v3460_v1, %v3457_v63 }
 0x277   : > { %2591 = vmatprep.mubr.msk.bf16.mxu0 %vm610_vm1, %v1670_v5  ;;  %v2615_v5 = vadd.f32 %v2362_v28, %v3413_v51 }
 0x278   : > { %2592 = vmatmul.mubr.msk.bf16.gmra.mrb[12].mxu0 %vm610_vm1, %v1671_v4 }
 0x279   : > { %2597 = vmatprep.mubr.msk.bf16.mxu0 %vm610_vm1, %v1754_v6 }
 0x280   : > { %2598 = vmatmul.mubr.msk.bf16.vlgmr.msra.gmra.mrb[8].mxu0 %vm610_vm1, %v1756_v52 }
 0x281   : > { %2601 = vmatprep.mubr.msk.bf16.mxu0 %vm610_vm1, %v1758_v11 }
 0x288   : > { %2602 = vmatmul.mubr.msk.bf16.gmra.mrb[12].mxu0 %vm610_vm1, %v1760_v20 }
 0x353   : > { %v2599_v29 = vpop.f32.mrb[8].mxu0 }
 0x354   : > { %v2638_v30 = vadd.f32 %v3482_v24, %v2599_v29  ;;  %v1807_v18 = vpop.f32.mrb[9].mxu0 }
 0x355   : > { %v2640_v33 = vadd.f32 %v3482_v24, %v1807_v18  ;;  %v2600_v22 = vpop.f32.mrb[10].mxu0 }
 0x356   : > { %v1848_v27 = vmax.f32 %v2638_v30, 0.0  ;;  %v2642_v15 = vadd.f32 %v3482_v24, %v2600_v22  ;;  %v1810_v19 = vpop.f32.mrb[11].mxu0 }
 0x357   : > { %v1846_v9 = vmax.f32 %v2640_v33, 0.0  ;;  %v2644_v37 = vadd.f32 %v3482_v24, %v1810_v19  ;;  %v2613_v33 = vadd.f32 %v3411_v43, %v2362_v28  ;;  %v2616_v19 = vadd.f32 %v2615_v5, %v2367_v14 }
 0x358   : > { %v1856_v49 = vmul.f32 %v3491_v45, %v1848_v27  ;;  %v1849_v53 = vmax.f32 %v2642_v15, 0.0  ;;  %v2620_v43 = vadd.f32 %v3482_v24, %v3417_v8 }
 0x359   : > { %v1847_v50 = vmax.f32 %v2644_v37, 0.0  ;;  %v1854_v4 = vmul.f32 %v3491_v45, %v1846_v9 }
 0x35a   : > { %v1868_v59 = vsel %vm610_vm1, %v1856_v49, 0.0  ;;  %v1857_v15 = vmul.f32 %v3491_v45, %v1849_v53 }
 0x35b   : > { %1869 = vadd.xlane.f32.xlu0 %v1868_v59  ;;  %v2603_v6 = vpop.f32.mrb[12].mxu0  ;;  %v1855_v52 = vmul.f32 %v3491_v45, %v1847_v50  ;;  %v1862_v51 = vsel %vm610_vm1, %v1854_v4, 0.0 }
 0x35c   : > { %v2646_v11 = vadd.f32 %v3482_v24, %v2603_v6  ;;  %v1823_v20 = vpop.f32.mrb[13].mxu0  ;;  %v2614_v6 = vadd.f32 %v2613_v33, %v2367_v14  ;;  %v2618_v14 = vadd.f32 %v3482_v24, %v3415_v56 }
 0x35d   : > { %v2648_v29 = vadd.f32 %v3482_v24, %v1823_v20  ;;  %v2604_v30 = vpop.f32.mrb[14].mxu0  ;;  %v1865_v18 = vsel %vm610_vm1, %v1855_v52, 0.0  ;;  %v1871_v52 = vsel %vm610_vm1, %v1857_v15, 0.0  ;;  %v1198_v20 = vmax.f32 %v2616_v19, 0.0 }
 0x35e   : > { %v2650_v22 = vadd.f32 %v3482_v24, %v2604_v30  ;;  %1866 = vadd.xlane.f32.xlu1 %v1865_v18  ;;  %v1826_v27 = vpop.f32.mrb[15].mxu0  ;;  %v1852_v9 = vmax.f32 %v2646_v11, 0.0  ;;  %v1200_v30 = vmax.f32 %v2614_v6, 0.0  ;;  %v2624_v18 = vadd.f32 %v3482_v24, %v3421_v23 }
 0x35f   : > { %v1850_v37 = vmax.f32 %v2648_v29, 0.0  ;;  %v2652_v49 = vadd.f32 %v3482_v24, %v1826_v27  ;;  %1863 = vadd.xlane.f32.xlu0 %v1862_v51  ;;  %v1199_v29 = vmax.f32 %v2620_v43, 0.0  ;;  %v1201_v27 = vmax.f32 %v2618_v14, 0.0 }
 0x360   : > { %v1853_v28 = vmax.f32 %v2650_v22, 0.0  ;;  %v1860_v5 = vmul.f32 %v3491_v45, %v1852_v9  ;;  %v1213_v22 = vmul.f32 %v3491_v45, %v1198_v20  ;;  %v2628_v51 = vadd.f32 %v3482_v24, %v3425_v26 }
 0x361   : > { %v1851_v50 = vmax.f32 %v2652_v49, 0.0  ;;  %v1858_v59 = vmul.f32 %v3491_v45, %v1850_v37  ;;  %v1214_v56 = vmul.f32 %v3491_v45, %v1199_v29  ;;  %v2622_v19 = vadd.f32 %v3482_v24, %v3419_v16  ;;  %v3543_v29 = vld [vmem:[#allocation2] ss:$0 sm:$0xff] }
 0x362   : > { %v1861_v8 = vmul.f32 %v3491_v45, %v1853_v28  ;;  %v1880_v33 = vsel %vm610_vm1, %v1860_v5, 0.0  ;;  %v1202_v9 = vmax.f32 %v2624_v18, 0.0  ;;  %v1221_v23 = vsel %vm610_vm1, %v1213_v22, 0.0 }
 0x363   : > { %1872 = vadd.xlane.f32.xlu0 %v1871_v52  ;;  %v1874_v53 = vsel %vm610_vm1, %v1858_v59, 0.0  ;;  %v1859_v4 = vmul.f32 %v3491_v45, %v1851_v50  ;;  %v1215_v37 = vmul.f32 %v3491_v45, %v1200_v30  ;;  %v2626_v49 = vadd.f32 %v3482_v24, %v3423_v25 }
 0x364   : > { %1875 = vadd.xlane.f32.xlu1 %v1874_v53  ;;  %v1883_v15 = vsel %vm610_vm1, %v1861_v8, 0.0  ;;  %v1203_v50 = vmax.f32 %v2628_v51, 0.0  ;;  %v1224_v26 = vsel %vm610_vm1, %v1214_v56, 0.0  ;;  %v1216_v59 = vmul.f32 %v3491_v45, %v1201_v27 }
 0x365   : > { %v1877_v11 = vsel %vm610_vm1, %v1859_v4, 0.0  ;;  %v1204_v6 = vmax.f32 %v2622_v19, 0.0  ;;  %v1227_v43 = vsel %vm610_vm1, %v1215_v37, 0.0  ;;  %v1217_v16 = vmul.f32 %v3491_v45, %v1202_v9 }
 0x366   : > { %v1205_v28 = vmax.f32 %v2626_v49, 0.0  ;;  %v1230_v52 = vsel %vm610_vm1, %v1216_v59, 0.0  ;;  %v1218_v20 = vmul.f32 %v3491_v45, %v1203_v50 }
 0x367   : > { %1878 = vadd.xlane.f32.xlu0 %v1877_v11  ;;  %v1233_v25 = vsel %vm610_vm1, %v1217_v16, 0.0  ;;  %v1219_v24 = vmul.f32 %v3491_v45, %v1204_v6 }
 0x368   : > { %1881 = vadd.xlane.f32.xlu1 %v1880_v33  ;;  %v1236_v53 = vsel %vm610_vm1, %v1218_v20, 0.0  ;;  %v1220_v4 = vmul.f32 %v3491_v45, %v1205_v28 }
 0x369   : > { %v1239_v5 = vsel %vm610_vm1, %v1219_v24, 0.0 }
 0x36a   : > { %v1242_v11 = vsel %vm610_vm1, %v1220_v4, 0.0 }
 0x36b   : > { %1884 = vadd.xlane.f32.xlu0 %v1883_v15 }
 0x36c   : > { %1222 = vadd.xlane.f32.xlu1 %v1221_v23 }
 0x36f   : > { %1225 = vadd.xlane.f32.xlu0 %v1224_v26 }
 0x370   : > { %1228 = vadd.xlane.f32.xlu1 %v1227_v43 }
 0x373   : > { %1231 = vadd.xlane.f32.xlu0 %v1230_v52 }
 0x374   : > { %1234 = vadd.xlane.f32.xlu1 %v1233_v25 }
 0x377   : > { %1237 = vadd.xlane.f32.xlu0 %v1236_v53 }
 0x378   : > { %1240 = vadd.xlane.f32.xlu1 %v1239_v5 }
 0x37b   : > { %1243 = vadd.xlane.f32.xlu0 %v1242_v11 }
 0x3e8   : > { %v1870_v14 = vpop.xlane.xlu0 %1869 }
 0x3e9   : > { %v1888_v45 = vadd.f32 %v3543_v29, %v1870_v14 }
 0x3eb   : > { %v1867_v30 = vpop.xlane.xlu1 %1866  ;;  %v2412_v9 = vmul.f32 -1.442695, %v1888_v45 }
 0x3ec   : > { %v1864_v8 = vpop.xlane.xlu0 %1863  ;;  %v1887_v43 = vadd.f32 %v3543_v29, %v1867_v30 }
 0x3ed   : > { %v1886_v18 = vadd.f32 %v3543_v29, %v1864_v8 }
 0x3ee   : > { %v2411_v20 = vmul.f32 -1.442695, %v1887_v43 }
 0x3ef   : > { %v2410_v33 = vmul.f32 -1.442695, %v1886_v18 }
 0x3f0   : > { %v1873_v51 = vpop.xlane.xlu0 %1872 }
 0x3f1   : > { %2866 = vpow2.f32 %v2410_v33  ;;  %v1876_v22 = vpop.xlane.xlu1 %1875  ;;  %v1889_v23 = vadd.f32 %v3543_v29, %v1873_v51 }
 0x3f2   : > { %v1890_v11 = vadd.f32 %v3543_v29, %v1876_v22 }
 0x3f3   : > { %v2413_v59 = vmul.f32 -1.442695, %v1889_v23 }
 0x3f4   : > { %v1879_v6 = vpop.xlane.xlu0 %1878  ;;  %v2414_v45 = vmul.f32 -1.442695, %v1890_v11 }
 0x3f5   : > { %v1882_v27 = vpop.xlane.xlu1 %1881 }
 0x3f6   : > { %v1892_v25 = vadd.f32 %v3543_v29, %v1882_v27  ;;  %v1891_v27 = vadd.f32 %v3543_v29, %v1879_v6 }
 0x3f8   : > { %v1885_v53 = vpop.xlane.xlu0 %1884  ;;  %v2416_v8 = vmul.f32 -1.442695, %v1892_v25  ;;  %v2415_v22 = vmul.f32 -1.442695, %v1891_v27 }
 0x3f9   : > { %v1223_v15 = vpop.xlane.xlu1 %1222 }
 0x3fa   : > { %v1252_v56 = vadd.f32 %v3543_v29, %v1223_v15 }
 0x3fb   : > { %v2867_v19 = vpop.eup %2866 }
 0x3fc   : > { %v1918_v37 = vadd.f32 1.0, %v2867_v19  ;;  %v2374_v49 = vmul.f32 -1.442695, %v1252_v56  ;;  %v1226_v15 = vpop.xlane.xlu0 %1225 }
 0x3fd   : > { %v1229_v50 = vpop.xlane.xlu1 %1228 }
 0x3fe   : > { %2868 = vrcp.f32 %v1918_v37  ;;  %v1254_v26 = vadd.f32 %v3543_v29, %v1229_v50  ;;  %v1893_v37 = vadd.f32 %v3543_v29, %v1885_v53 }
 0x3ff   : > { %2870 = vpow2.f32 %v2412_v9 }
 0x400   : > { %2872 = vpow2.f32 %v2374_v49  ;;  %v2376_v16 = vmul.f32 -1.442695, %v1254_v26  ;;  %v1232_v26 = vpop.xlane.xlu0 %1231 }
 0x401   : > { %v1235_v28 = vpop.xlane.xlu1 %1234  ;;  %2874 = vpow2.f32 %v2413_v59 }
 0x402   : > { %v1256_v52 = vadd.f32 %v3543_v29, %v1235_v28  ;;  %2876 = vpow2.f32 %v2376_v16  ;;  %v2417_v16 = vmul.f32 -1.442695, %v1893_v37  ;;  %v1253_v28 = vadd.f32 %v3543_v29, %v1226_v15 }
 0x404   : > { %v2378_v24 = vmul.f32 -1.442695, %v1256_v52  ;;  %v2375_v53 = vmul.f32 -1.442695, %v1253_v28 }
 0x405   : > { %v1241_v4 = vpop.xlane.xlu1 %1240 }
 0x406   : > { %v1258_v5 = vadd.f32 %v3543_v29, %v1241_v4  ;;  %2878 = vpow2.f32 %v2378_v24  ;;  %v1238_v4 = vpop.xlane.xlu0 %1237 }
 0x407   : > { %2880 = vpow2.f32 %v2411_v20 }
 0x408   : > { %v2869_v14 = vpop.eup %2868  ;;  %v2380_v30 = vmul.f32 -1.442695, %v1258_v5  ;;  %v1255_v5 = vadd.f32 %v3543_v29, %v1232_v26 }
 0x409   : > { %v2871_v18 = vpop.eup %2870  ;;  %1944 = vperm.xlu0 %2790, %v2869_v14  }
 0x40a   : > { %v2873_v33 = vpop.eup %2872  ;;  %2882 = vpow2.f32 %v2380_v30  ;;  %v1920_v56 = vadd.f32 1.0, %v2871_v18  ;;  %v2377_v18 = vmul.f32 -1.442695, %v1255_v5 }
 0x40b   : > { %v1284_v51 = vadd.f32 1.0, %v2873_v33  ;;  %2884 = vpow2.f32 %v2416_v8  ;;  %v2875_v19 = vpop.eup %2874  ;;  %v1257_v33 = vadd.f32 %v3543_v29, %v1238_v4 }
 0x40c   : > { %v2877_v9 = vpop.eup %2876  ;;  %v1921_v50 = vadd.f32 1.0, %v2875_v19 }
 0x40d   : > { %2886 = vrcp.f32 %v1284_v51  ;;  %v1286_v23 = vadd.f32 1.0, %v2877_v9  ;;  %v1244_v51 = vpop.xlane.xlu0 %1243  ;;  %v2379_v19 = vmul.f32 -1.442695, %v1257_v33 }
 0x40e   : > { %2888 = vpow2.f32 %v2414_v45  ;;  %v1259_v9 = vadd.f32 %v3543_v29, %v1244_v51 }
 0x40f   : > { %2890 = vrcp.f32 %v1920_v56 }
 0x410   : > { %v2879_v49 = vpop.eup %2878  ;;  %2892 = vrcp.f32 %v1286_v23 }
 0x411   : > { %v2881_v59 = vpop.eup %2880  ;;  %v1288_v43 = vadd.f32 1.0, %v2879_v49  ;;  %2894 = vpow2.f32 %v2415_v22 }
 0x412   : > { %v1919_v52 = vadd.f32 1.0, %v2881_v59 }
 0x413   : > { %2896 = vrcp.f32 %v1288_v43 }
 0x414   : > { %v2883_v6 = vpop.eup %2882  ;;  %2898 = vrcp.f32 %v1921_v50  ;;  %v2381_v50 = vmul.f32 -1.442695, %v1259_v9 }
 0x415   : > { %v1290_v20 = vadd.f32 1.0, %v2883_v6  ;;  %v2885_v25 = vpop.eup %2884 }
 0x416   : > { %v1924_v14 = vadd.f32 1.0, %v2885_v25 }
 0x417   : > { %v2887_v24 = vpop.eup %2886  ;;  %2900 = vrcp.f32 %v1290_v20 }
 0x418   : > { %2902 = vpow2.f32 %v2417_v16  ;;  %1310 = vperm.xlu1 %2789, %v2887_v24   ;;  %v2889_v11 = vpop.eup %2888 }
 0x419   : > { %2904 = vrcp.f32 %v1919_v52  ;;  %v2891_v8 = vpop.eup %2890  ;;  %v1922_v27 = vadd.f32 1.0, %v2889_v11 }
 0x41a   : > { %v2893_v30 = vpop.eup %2892  ;;  %2906 = vpow2.f32 %v2375_v53 }
 0x41b   : > { %1320 = vperm.xlu0 %2790, %v2893_v30   ;;  %v2895_v45 = vpop.eup %2894  ;;  %2908 = vrcp.f32 %v1924_v14 }
 0x41c   : > { %1954 = vperm.xlu1 %2789, %v2891_v8   ;;  %2910 = vpow2.f32 %v2377_v18  ;;  %v1923_v23 = vadd.f32 1.0, %v2895_v45 }
 0x41d   : > { %v2897_v15 = vpop.eup %2896  ;;  %2912 = vrcp.f32 %v1922_v27 }
 0x41e   : > { %v2899_v56 = vpop.eup %2898  ;;  %2914 = vpow2.f32 %v2379_v19 }
 0x41f   : > { %1330 = vperm.xlu0 %2790, %v2897_v15   ;;  %2916 = vrcp.f32 %v1923_v23 }
 0x420   : > { %1959 = vperm.xlu1 %2789, %v2899_v56   ;;  %2918 = vpow2.f32 %v2381_v50 }
 0x421   : > { %v2901_v22 = vpop.eup %2900 }
 0x422   : > { %v2903_v37 = vpop.eup %2902 }
 0x423   : > { %v2905_v49 = vpop.eup %2904  ;;  %1340 = vperm.xlu0 %2790, %v2901_v22   ;;  %v1925_v26 = vadd.f32 1.0, %v2903_v37 }
 0x424   : > { %1949 = vperm.xlu1 %2789, %v2905_v49   ;;  %v2907_v59 = vpop.eup %2906 }
 0x425   : > { %v2909_v43 = vpop.eup %2908  ;;  %2920 = vrcp.f32 %v1925_v26  ;;  %v1285_v29 = vadd.f32 1.0, %v2907_v59 }
 0x426   : > { %v2911_v6 = vpop.eup %2910 }
 0x427   : > { %2792 = vrot.lane.b32.xlu0 %v2791_v0, %s2988_s13  ;;  %v2913_v16 = vpop.eup %2912  ;;  %2922 = vrcp.f32 %v1285_v29  ;;  %v1287_v28 = vadd.f32 1.0, %v2911_v6 }
 0x428   : > { %1974 = vperm.xlu1 %2789, %v2909_v43   ;;  %v2915_v52 = vpop.eup %2914 }
 0x429   : > { %v2917_v20 = vpop.eup %2916  ;;  %2924 = vrcp.f32 %v1287_v28  ;;  %v1289_v60 = vadd.f32 1.0, %v2915_v52 }
 0x42a   : > { %v2919_v61 = vpop.eup %2918 }
 0x42b   : > { %2802 = vrot.lane.b32.xlu0 %v2801_v21, %s2988_s13  ;;  %2926 = vrcp.f32 %v1289_v60  ;;  %v1291_v25 = vadd.f32 1.0, %v2919_v61 }
 0x42c   : > { %1964 = vperm.xlu1 %2789, %v2913_v16  }
 0x42d   : > { %2928 = vrcp.f32 %v1291_v25 }
 0x42f   : > { %2812 = vrot.lane.b32.xlu0 %v2811_v42, %s2989_s14  ;;  %v2921_v0 = vpop.eup %2920 }
 0x430   : > { %1969 = vperm.xlu1 %2789, %v2917_v20  }
 0x431   : > { %v2923_v12 = vpop.eup %2922 }
 0x433   : > { %v2925_v13 = vpop.eup %2924 }
 0x434   : > { %1979 = vperm.xlu1 %2789, %v2921_v0  }
 0x435   : > { %v2927_v21 = vpop.eup %2926 }
 0x437   : > { %v2929_v24 = vpop.eup %2928 }
 0x438   : > { %1315 = vperm.xlu1 %2789, %v2923_v12  }
 0x43c   : > { %1325 = vperm.xlu1 %2789, %v2925_v13  }
 0x440   : > { %1335 = vperm.xlu1 %2789, %v2927_v21  }
 0x444   : > { %1345 = vperm.xlu1 %2789, %v2929_v24  }
 0x448   : > { %2797 = vrot.lane.b32.xlu1 %v2796_v62, %s2988_s13 }
 0x44c   : > { %2807 = vrot.lane.b32.xlu1 %v2806_v17, %s2988_s13 }
 0x450   : > { %2817 = vrot.lane.b32.xlu1 %v2816_v36, %s2989_s14 }
 0x488   : > { %v1945_v5 = vpop.permute.xlu0 %1944 }
 0x489   : > { %v1982_v62 = vmul.f32 %v1945_v5, %v3286_v38 }
 0x497   : > { %v1311_v34 = vpop.permute.xlu1 %1310 }
 0x498   : > { %v1348_v20 = vmul.f32 %v1311_v34, %v3286_v38 }
 0x49a   : > { %v1321_v51 = vpop.permute.xlu0 %1320 }
 0x49b   : > { %v1955_v35 = vpop.permute.xlu1 %1954  ;;  %v1350_v54 = vmul.f32 %v1321_v51, %v3296_v44 }
 0x49c   : > { %v1984_v4 = vmul.f32 %v1955_v35, %v3296_v44 }
 0x49e   : > { %v1331_v56 = vpop.permute.xlu0 %1330 }
 0x49f   : > { %v1960_v42 = vpop.permute.xlu1 %1959 }
 0x4a0   : > { %v1985_v53 = vmul.f32 %v1960_v42, %v3300_v46 }
 0x4a2   : > { %v2821_v57 = vpack.i.bf16 %v1985_v53, %v1984_v4  ;;  %v3607_v9 = vpop.permute.xlu0 %1340 }
 0x4a3   : > { %v1950_v58 = vpop.permute.xlu1 %1949 }
 0x4a4   : > { %v1983_v7 = vmul.f32 %v1950_v58, %v3288_v39  ;;  %2822 = vrot.lane.b32.xlu1 %v2821_v57, %s2988_s13 }
 0x4a6   : > { %v2826_v10 = vpack.i.bf16 %v1983_v7, %v1982_v62  ;;  %v2793_v23 = vpop.permute.xlu0 %2792 }
 0x4a7   : > { %v1975_v17 = vpop.permute.xlu1 %1974  ;;  %v2794_v26 = vunpack.i.l.bf16 %v2793_v23  ;;  %v2795_v60 = vunpack.i.h.bf16 %v2793_v23 }
 0x4a8   : > { %2827 = vrot.lane.b32.xlu0 %v2826_v10, %s2988_s13  ;;  %v1988_v30 = vmul.f32 %v1975_v17, %v3302_v47  ;;  %v1352_v17 = vmul.f32 %v1331_v56, %v3290_v40  ;;  %v1354_v56 = vmul.f32 %v3607_v9, %v3302_v47 }
 0x4a9   : > { %v2086_v24 = vsel %vm610_vm1, %v1348_v20, %v2794_v26 }
 0x4aa   : > { %v2803_v63 = vpop.permute.xlu0 %2802 }
 0x4ab   : > { %v1965_v31 = vpop.permute.xlu1 %1964  ;;  %v2804_v62 = vunpack.i.l.bf16 %v2803_v63 }
 0x4ac   : > { %v1986_v36 = vmul.f32 %v1965_v31, %v3290_v40  ;;  %v2805_v31 = vunpack.i.h.bf16 %v2803_v63 }
 0x4ae   : > { %v2813_v55 = vpop.permute.xlu0 %2812 }
 0x4af   : > { %v1970_v32 = vpop.permute.xlu1 %1969  ;;  %v2815_v35 = vunpack.i.h.bf16 %v2813_v55  ;;  %v2814_v42 = vunpack.i.l.bf16 %v2813_v55 }
 0x4b0   : > { %v1987_v11 = vmul.f32 %v1970_v32, %v3292_v41 }
 0x4b2   : > { %v2836_v14 = vpack.i.bf16 %v1987_v11, %v1986_v36  ;;  %v2090_v11 = vsel %vm610_vm1, %v1352_v17, %v2804_v62 }
 0x4b3   : > { %v1980_v8 = vpop.permute.xlu1 %1979 }
 0x4b4   : > { %v1989_v18 = vmul.f32 %v1980_v8, %v3304_v48  ;;  %2837 = vrot.lane.b32.xlu0 %v2836_v14, %s2988_s13 }
 0x4b6   : > { %v2831_v33 = vpack.i.bf16 %v1989_v18, %v1988_v30 }
 0x4b7   : > { %v1316_v45 = vpop.permute.xlu1 %1315 }
 0x4b8   : > { %2832 = vrot.lane.b32.xlu1 %v2831_v33, %s2988_s13  ;;  %2842 = vrot.lane.b32.xlu0 %v2841_v2, %s2989_s14  ;;  %v1349_v59 = vmul.f32 %v1316_v45, %v3288_v39 }
 0x4ba   : > { %v2087_v4 = vsel %vm610_vm1, %v1349_v59, %v2795_v60 }
 0x4bb   : > { %v1326_v27 = vpop.permute.xlu1 %1325 }
 0x4bc   : > { %2847 = vrot.lane.b32.xlu1 %v2846_v3, %s2989_s14  ;;  %v1351_v3 = vmul.f32 %v1326_v27, %v3300_v46 }
 0x4bf   : > { %v1336_v15 = vpop.permute.xlu1 %1335 }
 0x4c0   : > { %v1353_v7 = vmul.f32 %v1336_v15, %v3292_v41 }
 0x4c2   : > { %v2091_v14 = vsel %vm610_vm1, %v1353_v7, %v2805_v31 }
 0x4c3   : > { %v3605_v19 = vpop.permute.xlu1 %1345 }
 0x4c7   : > { %v2798_v22 = vpop.permute.xlu1 %2797 }
 0x4c8   : > { %v2800_v2 = vunpack.i.h.bf16 %v2798_v22  ;;  %v2799_v49 = vunpack.i.l.bf16 %v2798_v22  ;;  %v1355_v22 = vmul.f32 %v3605_v19, %v3304_v48 }
 0x4ca   : > { %v2089_v6 = vsel %vm610_vm1, %v1351_v3, %v2800_v2  ;;  %v2088_v16 = vsel %vm610_vm1, %v1350_v54, %v2799_v49 }
 0x4cb   : > { %v3609_v37 = vpop.permute.xlu1 %2807 }
 0x4cc   : > { %v2810_v18 = vunpack.i.h.bf16 %v3609_v37  ;;  %v2809_v33 = vunpack.i.l.bf16 %v3609_v37 }
 0x4ce   : > { %v2093_v49 = vsel %vm610_vm1, %v1355_v22, %v2810_v18  ;;  %v2092_v54 = vsel %vm610_vm1, %v1354_v56, %v2809_v33 }
 0x4cf   : > { %v2818_v1 = vpop.permute.xlu1 %2817 }
 0x4d0   : > { %v2820_v28 = vunpack.i.h.bf16 %v2818_v1  ;;  %v2819_v52 = vunpack.i.l.bf16 %v2818_v1 }
 0x516   : > { %v2823_v50 = vpop.permute.xlu1 %2822 }
 0x517   : > { %v2825_v43 = vunpack.i.h.bf16 %v2823_v50  ;;  %v2824_v29 = vunpack.i.l.bf16 %v2823_v50 }
 0x519   : > { %v2097_v44 = vsel %vm2094_vm4, %v2088_v16, %v2824_v29  ;;  %v2098_v46 = vsel %vm2094_vm4, %v2089_v6, %v2825_v43 }
 0x51a   : > { %v2106_v39 = vsel %vm2103_vm5, %v2097_v44, %v2819_v52  ;;  %v2107_v61 = vsel %vm2103_vm5, %v2098_v46, %v2820_v28  ;;  %v2828_v0 = vpop.permute.xlu0 %2827 }
 0x51b   : > { %v2114_v25 = vpack.c.bf16 %v2106_v39, %v2106_v39  ;;  %v2115_v12 = vpack.c.bf16 %v2107_v61, %v2107_v61  ;;  %v2830_v13 = vunpack.i.h.bf16 %v2828_v0  ;;  %v2829_v21 = vunpack.i.l.bf16 %v2828_v0 }
 0x51d   : > { %2123 = vst.msk [vmem:[%s3625_s15 + $0x8] sm:$0xf] %vm2120_vm6, %v2114_v25  ;;  %2124 = vst.msk [vmem:[%s3625_s15 + $0xc] sm:$0xf] %vm2120_vm6, %v2115_v12  ;;  %v2095_v38 = vsel %vm2094_vm4, %v2086_v24, %v2829_v21  ;;  %v2096_v34 = vsel %vm2094_vm4, %v2087_v4, %v2830_v13 }
 0x51e   : > { %v2104_v53 = vsel %vm2103_vm5, %v2095_v38, %v2814_v42  ;;  %v2105_v5 = vsel %vm2103_vm5, %v2096_v34, %v2815_v35 }
 0x51f   : > { %v2112_v57 = vpack.c.bf16 %v2104_v53, %v2104_v53  ;;  %v2113_v58 = vpack.c.bf16 %v2105_v5, %v2105_v5 }
 0x521   : > { %2121 = vst.msk [vmem:[%s3625_s15] sm:$0xf] %vm2120_vm6, %v2112_v57  ;;  %2122 = vst.msk [vmem:[%s3625_s15 + $0x4] sm:$0xf] %vm2120_vm6, %v2113_v58 }
 0x524   : > { %v2159_v29 = vld [vmem:[%s3625_s15 + $0x8] sm:$0xf] (%p3096_p6)  ;;  %v2161_v6 = vld [vmem:[%s3625_s15 + $0xc] sm:$0xf] (%p3096_p6) }
 0x525   : > { %2160 = vst [vmem:[%s2139_s9 + $0x10] sm:$0xf] (%p3096_p6), %v2159_v29  ;;  %2162 = vst [vmem:[%s2139_s9 + $0x18] sm:$0xf] (%p3096_p6), %v2161_v6 }
 0x526   : > { %v2838_v10 = vpop.permute.xlu0 %2837 }
 0x527   : > { %v2840_v32 = vunpack.i.h.bf16 %v2838_v10  ;;  %v2839_v36 = vunpack.i.l.bf16 %v2838_v10 }
 0x528   : > { %v2155_v59 = vld [vmem:[%s3625_s15] sm:$0xf] (%p3096_p6)  ;;  %v2157_v43 = vld [vmem:[%s3625_s15 + $0x4] sm:$0xf] (%p3096_p6) }
 0x529   : > { %v2099_v41 = vsel %vm2094_vm4, %v2090_v11, %v2839_v36  ;;  %v2100_v51 = vsel %vm2094_vm4, %v2091_v14, %v2840_v32  ;;  %2156 = vst [vmem:[%s2139_s9] sm:$0xf] (%p3096_p6), %v2155_v59  ;;  %2158 = vst [vmem:[%s2139_s9 + $0x8] sm:$0xf] (%p3096_p6), %v2157_v43 }
 0x52a   : > { %v2833_v8 = vpop.permute.xlu1 %2832  ;;  %v2843_v30 = vpop.permute.xlu0 %2842 }
 0x52b   : > { %v2845_v45 = vunpack.i.h.bf16 %v2843_v30  ;;  %v2844_v27 = vunpack.i.l.bf16 %v2843_v30  ;;  %v2835_v40 = vunpack.i.h.bf16 %v2833_v8  ;;  %v2834_v15 = vunpack.i.l.bf16 %v2833_v8 }
 0x52d   : > { %v2108_v23 = vsel %vm2103_vm5, %v2099_v41, %v2844_v27  ;;  %v2109_v37 = vsel %vm2103_vm5, %v2100_v51, %v2845_v45  ;;  %v2101_v47 = vsel %vm2094_vm4, %v2092_v54, %v2834_v15  ;;  %v2102_v9 = vsel %vm2094_vm4, %v2093_v49, %v2835_v40 }
 0x52e   : > { %v2116_v63 = vpack.c.bf16 %v2108_v23, %v2108_v23  ;;  %v2117_v1 = vpack.c.bf16 %v2109_v37, %v2109_v37  ;;  %v2848_v2 = vpop.permute.xlu1 %2847  ;;  %2135 = sbr.rel (!%p3096_p6) target bundleno = 1341 (0x53d), region = 102 }
 0x52f   : > { %v2850_v55 = vunpack.i.h.bf16 %v2848_v2  ;;  %v2849_v3 = vunpack.i.l.bf16 %v2848_v2 }
 0x530   : > { %2125 = vst.msk [vmem:[%s3625_s15 + $0x10] sm:$0xf] %vm2120_vm6, %v2116_v63  ;;  %2126 = vst.msk [vmem:[%s3625_s15 + $0x14] sm:$0xf] %vm2120_vm6, %v2117_v1 }
 0x531   : > { %v2110_v48 = vsel %vm2103_vm5, %v2101_v47, %v2849_v3  ;;  %v2111_v19 = vsel %vm2103_vm5, %v2102_v9, %v2850_v55 }
 0x532   : > { %v2118_v50 = vpack.c.bf16 %v2110_v48, %v2110_v48  ;;  %v2119_v26 = vpack.c.bf16 %v2111_v19, %v2111_v19 }
 0x534   : > { %2127 = vst.msk [vmem:[%s3625_s15 + $0x18] sm:$0xf] %vm2120_vm6, %v2118_v50  ;;  %2128 = vst.msk [vmem:[%s3625_s15 + $0x1c] sm:$0xf] %vm2120_vm6, %v2119_v26 }
 0x537   : > { %v2163_v16 = vld [vmem:[%s3625_s15 + $0x10] sm:$0xf]  ;;  %v2165_v28 = vld [vmem:[%s3625_s15 + $0x14] sm:$0xf] }
 0x538   : > { %2164 = vst [vmem:[%s2139_s9 + $0x20] sm:$0xf] %v2163_v16  ;;  %2166 = vst [vmem:[%s2139_s9 + $0x28] sm:$0xf] %v2165_v28 }
 0x53b   : > { %v2167_v52 = vld [vmem:[%s3625_s15 + $0x18] sm:$0xf]  ;;  %v2169_v44 = vld [vmem:[%s3625_s15 + $0x1c] sm:$0xf] }
 0x53c   : > { %2168 = vst [vmem:[%s2139_s9 + $0x30] sm:$0xf] %v2167_v52  ;;  %2170 = vst [vmem:[%s2139_s9 + $0x38] sm:$0xf] %v2169_v44 }
 0x53d PF: > { %s22_s21 = sadd.s32 1, %s2984_s21   ;;  %s3719_s27 = sld [smem:[#allocation5_spill]] }
 0x53e   : > { %p19_p0 = scmp.ge.s32.totalorder %s22_s21, 6   ;;  %s3720_s15 = smov %s2964_s16 }
 0x53f   : > { %s3721_s16 = smov %s3104_s29  ;;  %s3722_s17 = smov %s2976_s19 }
 0x540   : > { %s3723_s18 = smov %s2980_s20  ;;  %s3725_s20 = smov %s3731_s22 }
 0x541   :  { %21 = sbr.rel (!%p19_p0) target bundleno = 7 (0x7), region = 187 }
 0x543   : > { %s3724_s19 = smov %s3719_s27 }

</bundles_post_ra>
